<compile_context>
chip_gen: v7x
topology: tpu7x:2x2x1
jax: 0.10.0
libtpu: 0.0.40
codegen_flags: <defaults>
</compile_context>

<pallas_src>
import functools

import jax
import jax.numpy as jnp
from jax import lax
from jax.experimental import pallas as pl
from jax.experimental.pallas import tpu as pltpu

# ----------------------------- model config ---------------------------------
D_MODEL = 32
N_HEAD = 4
DIM_FF = 64
NUM_LAYERS = 2
LN_EPS = 1e-5
HEAD_DIM = D_MODEL // N_HEAD

_MAX_ROWS_PER_STEP = 2048     # bt*S cap; keeps double-buffered blocks tiny vs VMEM


def _mm(a, b):
    """Plain a @ b with f32 accumulation (weights are pre-transposed host-side)."""
    return jnp.dot(a, b, preferred_element_type=jnp.float32)


def _layernorm(x, w, b, eps):
    mu = jnp.mean(x, axis=-1, keepdims=True)
    xc = x - mu
    var = jnp.mean(xc * xc, axis=-1, keepdims=True)
    return xc * lax.rsqrt(var + eps) * w + b


# ------------------------------ Pallas kernel --------------------------------
def _encoder_kernel(src_ref,                 # (bt, S*E)   lane-dense block
                    in_wT_ref,               # (L, E, 3E)
                    out_wT_ref,              # (L, E, E)
                    l1_wT_ref,               # (L, E, F)
                    l2_wT_ref,               # (L, F, E)
                    misc_ref,                # (L, 8, max(3E,F)) packed small params
                    o_ref,                   # (bt, S*E)
                    *, bt, seq, num_layers, n_head, head_dim, dim_ff, eps):
    e = n_head * head_dim
    rows = bt * seq
    scale = 1.0 / float(head_dim) ** 0.5

    # ---- unpack the lane-dense (bt, seq*e) block into the (rows, e) working
    # layout once per step (32-lane slices at aligned offsets + sublane stack).
    x2d = src_ref[...].astype(jnp.float32)                       # (bt, seq*e)
    x = jnp.stack([x2d[:, s * e:(s + 1) * e] for s in range(seq)],
                  axis=1).reshape(rows, e)                       # (rows, e)

    for l in range(num_layers):              # static, unrolled layer loop
        misc = misc_ref[l]                                       # (8, W)
        in_b, l1_b = misc[0, :3 * e], misc[1, :dim_ff]
        out_b, l2_b = misc[2, :e], misc[3, :e]
        n1_w, n1_b = misc[4, :e], misc[5, :e]
        n2_w, n2_b = misc[6, :e], misc[7, :e]

        # ---- self attention -------------------------------------------------
        # Fused QKV projection: one (rows, E) @ (E, 3E) matmul.
        qkv = _mm(x, in_wT_ref[l]) + in_b                        # (rows, 3e)

        def split_heads(base):
            # columns [h][d] -> (n_head*bt, seq, head_dim), batch order (h, b)
            return jnp.concatenate(
                [qkv[:, base + h * head_dim: base + (h + 1) * head_dim]
                     .reshape(bt, seq, head_dim) for h in range(n_head)],
                axis=0)

        q = split_heads(0)
        k = split_heads(e)
        v = split_heads(2 * e)

        # ALL heads at once: two batched einsums over n = n_head*bt.
        s = jnp.einsum("nqd,nkd->nqk", q, k,
                       preferred_element_type=jnp.float32) * scale
        m = jnp.max(s, axis=-1, keepdims=True)
        p = jnp.exp(s - m)
        p = p * pl.reciprocal(jnp.sum(p, axis=-1, keepdims=True),
                              approx=True)                       # EUP slot
        ctx = jnp.einsum("nqk,nkd->nqd", p, v,
                         preferred_element_type=jnp.float32)     # (n*seq? no) (n, S, Dh)

        # Merge heads back to (rows, e) lanes in [h][d] order, then ONE K=32
        # output projection (instead of 4 tiny K=8 per-head matmuls).
        ctx = jnp.concatenate(
            [ctx[h * bt:(h + 1) * bt].reshape(rows, head_dim)
             for h in range(n_head)], axis=-1)                   # (rows, e)
        attn = _mm(ctx, out_wT_ref[l]) + out_b

        x = _layernorm(x + attn, n1_w, n1_b, eps)

        # ---- feed forward ----------------------------------------------------
        h1 = jnp.maximum(_mm(x, l1_wT_ref[l]) + l1_b, 0.0)       # ReLU
        ff = _mm(h1, l2_wT_ref[l]) + l2_b
        x = _layernorm(x + ff, n2_w, n2_b, eps)

    # ---- repack to the lane-dense (bt, seq*e) output block (unmasked vst) ----
    x3 = x.reshape(bt, seq, e)
    o_ref[...] = jnp.concatenate([x3[:, s, :] for s in range(seq)],
                                 axis=-1).astype(o_ref.dtype)


# ------------------------------ wrapper --------------------------------------
def _const_spec(arr):
    """Full-array block with a constant index map: fetched once, then resident
    in VMEM across grid steps (block index never changes)."""
    nd = arr.ndim
    return pl.BlockSpec(arr.shape, lambda i, _nd=nd: (0,) * _nd)


def _num_tensorcores():
    """Best-effort detection of TensorCores per JAX device (megacore chips)."""
    try:
        kind = jax.devices()[0].device_kind.lower()
    except Exception:
        return 1
    if "lite" in kind or "v5e" in kind or "v6" in kind:
        return 1                       # v5e / v6e: single TC per chip
    if "v4" in kind or "v5" in kind or "v7" in kind or "7x" in kind:
        return 2                       # v4 / v5p / v7x: 2 TCs share the device
    return 1


def _choose_tiling(B, S, n_tc):
    """Single big step on single-TC chips; >=2 'parallel' steps on dual-TC
    chips (when the batch is big enough to be worth splitting)."""
    max_bt = max(1, _MAX_ROWS_PER_STEP // max(S, 1))
    want_steps = n_tc if (n_tc > 1 and B * S >= 256) else 1
    n_steps = max(want_steps, -(-B // max_bt))
    bt = -(-B // n_steps)
    if n_steps > 1:
        bt = ((bt + 7) // 8) * 8       # keep (bt, S*E) blocks (8,128)-tileable
    return bt, bt * n_steps, n_steps


def transformer_encoder(src, params):
    """src: (B, S, E) float32. params: stacked per-layer weights in the original
    PyTorch layout (see init_params)."""
    B, S, E = src.shape
    L, F, H, Dh = NUM_LAYERS, DIM_FF, N_HEAD, HEAD_DIM
    assert E == D_MODEL

    n_tc = _num_tensorcores()
    bt, B_pad, n_steps = _choose_tiling(B, S, n_tc)

    # Lane-dense I/O layout + optional batch padding (sliced off afterwards).
    src2d = src.reshape(B, S * E)
    if B_pad != B:
        src2d = jnp.concatenate(
            [src2d, jnp.zeros((B_pad - B, S * E), src.dtype)], axis=0)

    # Host-side weight re-layout (one-time, outside the kernel): transpose so
    # the kernel contracts the RHS leading dim (no in-kernel weight transposes).
    in_wT = jnp.transpose(params["in_w"], (0, 2, 1))     # (L, E, 3E)
    out_wT = jnp.transpose(params["out_w"], (0, 2, 1))   # (L, E, E)
    l1_wT = jnp.transpose(params["l1_w"], (0, 2, 1))     # (L, E, F)
    l2_wT = jnp.transpose(params["l2_w"], (0, 2, 1))     # (L, F, E)

    # Pack the ten tiny bias / LayerNorm vectors into one (L, 8, W) array.
    W = max(3 * E, F)
    pad_w = lambda a: jnp.pad(a, ((0, 0), (0, W - a.shape[-1])))
    misc = jnp.stack([pad_w(params["in_b"]), pad_w(params["l1_b"]),
                      pad_w(params["out_b"]), pad_w(params["l2_b"]),
                      pad_w(params["n1_w"]), pad_w(params["n1_b"]),
                      pad_w(params["n2_w"]), pad_w(params["n2_b"])],
                     axis=1)                              # (L, 8, W)

    weights = [in_wT, out_wT, l1_wT, l2_wT, misc]

    kernel = functools.partial(
        _encoder_kernel,
        bt=bt, seq=S, num_layers=L, n_head=H, head_dim=Dh, dim_ff=F,
        eps=LN_EPS)

    flops = int(2 * B * S * L * (E * 3 * E      # qkv projection
                                 + 2 * S * E    # scores + context
                                 + E * E        # output projection
                                 + 2 * E * F))  # feed forward
    transcendentals = int(B * L * H * S * (S + 2))
    bytes_accessed = int(2 * B_pad * S * E * src.dtype.itemsize
                         + sum(int(w.size) * w.dtype.itemsize for w in weights))

    # TODO(synk): on v7x verify with xprof that the 2 'parallel' steps land on
    # both TensorCores; if not, switch the batch axis to pltpu.CORE_PARALLEL.
    out2d = pl.pallas_call(
        kernel,
        out_shape=jax.ShapeDtypeStruct((B_pad, S * E), src.dtype),
        grid_spec=pltpu.PrefetchScalarGridSpec(
            num_scalar_prefetch=0,
            grid=(n_steps,),
            in_specs=[pl.BlockSpec((bt, S * E), lambda i: (i, 0))]
                     + [_const_spec(w) for w in weights],
            out_specs=pl.BlockSpec((bt, S * E), lambda i: (i, 0)),
        ),
        compiler_params=pltpu.CompilerParams(
            dimension_semantics=("parallel",)),
        cost_estimate=pl.CostEstimate(
            flops=flops, transcendentals=transcendentals,
            bytes_accessed=bytes_accessed),
    )(src2d, *weights)

    return out2d[:B].reshape(B, S, E)


# --------------------------- pure-JAX reference -------------------------------
def _reference(src, params):
    x = src.astype(jnp.float32)
    B, S, E = x.shape
    scale = 1.0 / (HEAD_DIM ** 0.5)
    for l in range(NUM_LAYERS):
        qkv = jnp.einsum("bse,fe->bsf", x, params["in_w"][l]) + params["in_b"][l]
        q, k, v = qkv[..., :E], qkv[..., E:2 * E], qkv[..., 2 * E:]
        qh = q.reshape(B, S, N_HEAD, HEAD_DIM)
        kh = k.reshape(B, S, N_HEAD, HEAD_DIM)
        vh = v.reshape(B, S, N_HEAD, HEAD_DIM)
        scores = jnp.einsum("bqhd,bkhd->bhqk", qh, kh) * scale
        p = jax.nn.softmax(scores, axis=-1)
        av = jnp.einsum("bhqk,bkhd->bqhd", p, vh).reshape(B, S, E)
        attn = jnp.einsum("bse,fe->bsf", av, params["out_w"][l]) + params["out_b"][l]

        def ln(y, w, b):
            mu = jnp.mean(y, -1, keepdims=True)
            var = jnp.mean((y - mu) ** 2, -1, keepdims=True)
            return (y - mu) / jnp.sqrt(var + LN_EPS) * w + b

        x = ln(x + attn, params["n1_w"][l], params["n1_b"][l])
        h1 = jax.nn.relu(
            jnp.einsum("bse,fe->bsf", x, params["l1_w"][l]) + params["l1_b"][l])
        ff = jnp.einsum("bsf,ef->bse", h1, params["l2_w"][l]) + params["l2_b"][l]
        x = ln(x + ff, params["n2_w"][l], params["n2_b"][l])
    return x


# ------------------------------ param init -----------------------------------
def init_params(key):
    ks = jax.random.split(key, 8)
    L, E, F = NUM_LAYERS, D_MODEL, DIM_FF
    s = 0.02
    return {
        "in_w":  jax.random.normal(ks[0], (L, 3 * E, E), jnp.float32) * s,
        "in_b":  jax.random.normal(ks[1], (L, 3 * E), jnp.float32) * s,
        "out_w": jax.random.normal(ks[2], (L, E, E), jnp.float32) * s,
        "out_b": jax.random.normal(ks[3], (L, E), jnp.float32) * s,
        "n1_w":  jnp.ones((L, E), jnp.float32),
        "n1_b":  jnp.zeros((L, E), jnp.float32),
        "n2_w":  jnp.ones((L, E), jnp.float32),
        "n2_b":  jnp.zeros((L, E), jnp.float32),
        "l1_w":  jax.random.normal(ks[4], (L, F, E), jnp.float32) * s,
        "l1_b":  jax.random.normal(ks[5], (L, F), jnp.float32) * s,
        "l2_w":  jax.random.normal(ks[6], (L, E, F), jnp.float32) * s,
        "l2_b":  jax.random.normal(ks[7], (L, E), jnp.float32) * s,
    }


if __name__ == "__main__":
    key = jax.random.PRNGKey(0)
    kp, kx = jax.random.split(key)
    params = init_params(kp)

    # Small shapes consistent with the module (batch=2, seq=8, d_model=32).
    B, S = 2, 8
    src = jax.random.normal(kx, (B, S, D_MODEL), jnp.float32)

    out = jax.block_until_ready(transformer_encoder(src, params))
    ref = _reference(src, params)
    assert out.shape == (B, S, D_MODEL)
    assert jnp.allclose(out, ref, atol=2e-4, rtol=2e-4), "mismatch vs reference (B=2)"

    # Larger batch: one big step on single-TC chips, 2 parallel steps on
    # dual-TC chips.
    B2 = 64
    src2 = jax.random.normal(jax.random.PRNGKey(1), (B2, S, D_MODEL), jnp.float32)
    out2 = jax.block_until_ready(transformer_encoder(src2, params))
    ref2 = _reference(src2, params)
    assert jnp.allclose(out2, ref2, atol=2e-4, rtol=2e-4), "mismatch vs reference (B=64)"

    # TODO(synk): mask / src_key_padding_mask / nested-tensor fast path not
    # implemented (forward here corresponds to mask=None, padding_mask=None).
    print("KERNEL_OK")
</pallas_src>

<mosaic_0001>
module attributes {stable_mosaic.version = 11 : i64} {
  func.func @_encoder_kernel(%arg0: i32, %arg1: memref<2x256xf32, #tpu.memory_space<vmem>>, %arg2: memref<2x32x96xf32, #tpu.memory_space<vmem>>, %arg3: memref<2x32x32xf32, #tpu.memory_space<vmem>>, %arg4: memref<2x32x64xf32, #tpu.memory_space<vmem>>, %arg5: memref<2x64x32xf32, #tpu.memory_space<vmem>>, %arg6: memref<2x8x96xf32, #tpu.memory_space<vmem>>, %arg7: memref<2x256xf32, #tpu.memory_space<vmem>>) attributes {dimension_semantics = [#tpu.dimension_semantics<parallel>], iteration_bounds = array<i64: 1>, scalar_prefetch = 0 : i64, scratch_operands = 0 : i64, tpu.core_type = #tpu.core_type<tc>, window_params = [{transform_indices = @transform_0, window_bounds = array<i64: 2, 256>}, {pipeline_mode = #tpu.pipeline_mode<synchronous>, transform_indices = @transform_1, window_bounds = array<i64: 2, 32, 96>}, {pipeline_mode = #tpu.pipeline_mode<synchronous>, transform_indices = @transform_2, window_bounds = array<i64: 2, 32, 32>}, {pipeline_mode = #tpu.pipeline_mode<synchronous>, transform_indices = @transform_3, window_bounds = array<i64: 2, 32, 64>}, {pipeline_mode = #tpu.pipeline_mode<synchronous>, transform_indices = @transform_4, window_bounds = array<i64: 2, 64, 32>}, {pipeline_mode = #tpu.pipeline_mode<synchronous>, transform_indices = @transform_5, window_bounds = array<i64: 2, 8, 96>}, {transform_indices = @transform_6, window_bounds = array<i64: 2, 256>}]} {
    %c0 = arith.constant 0 : index
    %c0_0 = arith.constant 0 : index
    %0 = vector.load %arg1[%c0, %c0_0] : memref<2x256xf32, #tpu.memory_space<vmem>>, vector<2x256xf32>
    %1 = vector.extract_strided_slice %0 {offsets = [0, 0], sizes = [2, 32], strides = [1, 1]} : vector<2x256xf32> to vector<2x32xf32>
    %2 = vector.extract_strided_slice %0 {offsets = [0, 32], sizes = [2, 32], strides = [1, 1]} : vector<2x256xf32> to vector<2x32xf32>
    %3 = vector.extract_strided_slice %0 {offsets = [0, 64], sizes = [2, 32], strides = [1, 1]} : vector<2x256xf32> to vector<2x32xf32>
    %4 = vector.extract_strided_slice %0 {offsets = [0, 96], sizes = [2, 32], strides = [1, 1]} : vector<2x256xf32> to vector<2x32xf32>
    %5 = vector.extract_strided_slice %0 {offsets = [0, 128], sizes = [2, 32], strides = [1, 1]} : vector<2x256xf32> to vector<2x32xf32>
    %6 = vector.extract_strided_slice %0 {offsets = [0, 160], sizes = [2, 32], strides = [1, 1]} : vector<2x256xf32> to vector<2x32xf32>
    %7 = vector.extract_strided_slice %0 {offsets = [0, 192], sizes = [2, 32], strides = [1, 1]} : vector<2x256xf32> to vector<2x32xf32>
    %8 = vector.extract_strided_slice %0 {offsets = [0, 224], sizes = [2, 32], strides = [1, 1]} : vector<2x256xf32> to vector<2x32xf32>
    %9 = vector.shape_cast %1 : vector<2x32xf32> to vector<2x1x32xf32>
    %10 = vector.shape_cast %2 : vector<2x32xf32> to vector<2x1x32xf32>
    %11 = vector.shape_cast %3 : vector<2x32xf32> to vector<2x1x32xf32>
    %12 = vector.shape_cast %4 : vector<2x32xf32> to vector<2x1x32xf32>
    %13 = vector.shape_cast %5 : vector<2x32xf32> to vector<2x1x32xf32>
    %14 = vector.shape_cast %6 : vector<2x32xf32> to vector<2x1x32xf32>
    %15 = vector.shape_cast %7 : vector<2x32xf32> to vector<2x1x32xf32>
    %16 = vector.shape_cast %8 : vector<2x32xf32> to vector<2x1x32xf32>
    %17 = tpu.concatenate %9, %10, %11, %12, %13, %14, %15, %16 in 1 : vector<2x1x32xf32>, vector<2x1x32xf32>, vector<2x1x32xf32>, vector<2x1x32xf32>, vector<2x1x32xf32>, vector<2x1x32xf32>, vector<2x1x32xf32>, vector<2x1x32xf32> -> vector<2x8x32xf32>
    %18 = vector.shape_cast %17 : vector<2x8x32xf32> to vector<16x32xf32>
    %c0_1 = arith.constant 0 : index
    %c0_2 = arith.constant 0 : index
    %c0_3 = arith.constant 0 : index
    %19 = vector.load %arg6[%c0_1, %c0_2, %c0_3] : memref<2x8x96xf32, #tpu.memory_space<vmem>>, vector<1x8x96xf32>
    %20 = vector.shape_cast %19 : vector<1x8x96xf32> to vector<8x96xf32>
    %21 = vector.extract_strided_slice %20 {offsets = [0, 0], sizes = [1, 96], strides = [1, 1]} : vector<8x96xf32> to vector<1x96xf32>
    %22 = vector.shape_cast %21 : vector<1x96xf32> to vector<96xf32>
    %23 = vector.extract_strided_slice %20 {offsets = [1, 0], sizes = [1, 64], strides = [1, 1]} : vector<8x96xf32> to vector<1x64xf32>
    %24 = vector.shape_cast %23 : vector<1x64xf32> to vector<64xf32>
    %25 = vector.extract_strided_slice %20 {offsets = [2, 0], sizes = [1, 32], strides = [1, 1]} : vector<8x96xf32> to vector<1x32xf32>
    %26 = vector.shape_cast %25 : vector<1x32xf32> to vector<32xf32>
    %27 = vector.extract_strided_slice %20 {offsets = [3, 0], sizes = [1, 32], strides = [1, 1]} : vector<8x96xf32> to vector<1x32xf32>
    %28 = vector.shape_cast %27 : vector<1x32xf32> to vector<32xf32>
    %29 = vector.extract_strided_slice %20 {offsets = [4, 0], sizes = [1, 32], strides = [1, 1]} : vector<8x96xf32> to vector<1x32xf32>
    %30 = vector.shape_cast %29 : vector<1x32xf32> to vector<32xf32>
    %31 = vector.extract_strided_slice %20 {offsets = [5, 0], sizes = [1, 32], strides = [1, 1]} : vector<8x96xf32> to vector<1x32xf32>
    %32 = vector.shape_cast %31 : vector<1x32xf32> to vector<32xf32>
    %33 = vector.extract_strided_slice %20 {offsets = [6, 0], sizes = [1, 32], strides = [1, 1]} : vector<8x96xf32> to vector<1x32xf32>
    %34 = vector.shape_cast %33 : vector<1x32xf32> to vector<32xf32>
    %35 = vector.extract_strided_slice %20 {offsets = [7, 0], sizes = [1, 32], strides = [1, 1]} : vector<8x96xf32> to vector<1x32xf32>
    %36 = vector.shape_cast %35 : vector<1x32xf32> to vector<32xf32>
    %c0_4 = arith.constant 0 : index
    %c0_5 = arith.constant 0 : index
    %c0_6 = arith.constant 0 : index
    %37 = vector.load %arg2[%c0_4, %c0_5, %c0_6] : memref<2x32x96xf32, #tpu.memory_space<vmem>>, vector<1x32x96xf32>
    %38 = vector.shape_cast %37 : vector<1x32x96xf32> to vector<32x96xf32>
    %cst = arith.constant dense<0.000000e+00> : vector<16x96xf32>
    %39 = tpu.matmul %18, %38, %cst {dimension_numbers = #tpu.dot_dimension_numbers<[1], [0], [0], [1], [0, 0, 1, 1], [], []>} : vector<16x32xf32>, vector<32x96xf32>, vector<16x96xf32> -> vector<16x96xf32>
    %40 = vector.shape_cast %22 : vector<96xf32> to vector<1x96xf32>
    %41 = vector.broadcast %40 : vector<1x96xf32> to vector<16x96xf32>
    %42 = arith.addf %39, %41 : vector<16x96xf32>
    %43 = vector.extract_strided_slice %42 {offsets = [0, 0], sizes = [16, 8], strides = [1, 1]} : vector<16x96xf32> to vector<16x8xf32>
    %44 = vector.shape_cast %43 : vector<16x8xf32> to vector<2x8x8xf32>
    %45 = vector.extract_strided_slice %42 {offsets = [0, 8], sizes = [16, 8], strides = [1, 1]} : vector<16x96xf32> to vector<16x8xf32>
    %46 = vector.shape_cast %45 : vector<16x8xf32> to vector<2x8x8xf32>
    %47 = vector.extract_strided_slice %42 {offsets = [0, 16], sizes = [16, 8], strides = [1, 1]} : vector<16x96xf32> to vector<16x8xf32>
    %48 = vector.shape_cast %47 : vector<16x8xf32> to vector<2x8x8xf32>
    %49 = vector.extract_strided_slice %42 {offsets = [0, 24], sizes = [16, 8], strides = [1, 1]} : vector<16x96xf32> to vector<16x8xf32>
    %50 = vector.shape_cast %49 : vector<16x8xf32> to vector<2x8x8xf32>
    %51 = tpu.concatenate %44, %46, %48, %50 in 0 : vector<2x8x8xf32>, vector<2x8x8xf32>, vector<2x8x8xf32>, vector<2x8x8xf32> -> vector<8x8x8xf32>
    %52 = vector.extract_strided_slice %42 {offsets = [0, 32], sizes = [16, 8], strides = [1, 1]} : vector<16x96xf32> to vector<16x8xf32>
    %53 = vector.shape_cast %52 : vector<16x8xf32> to vector<2x8x8xf32>
    %54 = vector.extract_strided_slice %42 {offsets = [0, 40], sizes = [16, 8], strides = [1, 1]} : vector<16x96xf32> to vector<16x8xf32>
    %55 = vector.shape_cast %54 : vector<16x8xf32> to vector<2x8x8xf32>
    %56 = vector.extract_strided_slice %42 {offsets = [0, 48], sizes = [16, 8], strides = [1, 1]} : vector<16x96xf32> to vector<16x8xf32>
    %57 = vector.shape_cast %56 : vector<16x8xf32> to vector<2x8x8xf32>
    %58 = vector.extract_strided_slice %42 {offsets = [0, 56], sizes = [16, 8], strides = [1, 1]} : vector<16x96xf32> to vector<16x8xf32>
    %59 = vector.shape_cast %58 : vector<16x8xf32> to vector<2x8x8xf32>
    %60 = tpu.concatenate %53, %55, %57, %59 in 0 : vector<2x8x8xf32>, vector<2x8x8xf32>, vector<2x8x8xf32>, vector<2x8x8xf32> -> vector<8x8x8xf32>
    %61 = vector.extract_strided_slice %42 {offsets = [0, 64], sizes = [16, 8], strides = [1, 1]} : vector<16x96xf32> to vector<16x8xf32>
    %62 = vector.shape_cast %61 : vector<16x8xf32> to vector<2x8x8xf32>
    %63 = vector.extract_strided_slice %42 {offsets = [0, 72], sizes = [16, 8], strides = [1, 1]} : vector<16x96xf32> to vector<16x8xf32>
    %64 = vector.shape_cast %63 : vector<16x8xf32> to vector<2x8x8xf32>
    %65 = vector.extract_strided_slice %42 {offsets = [0, 80], sizes = [16, 8], strides = [1, 1]} : vector<16x96xf32> to vector<16x8xf32>
    %66 = vector.shape_cast %65 : vector<16x8xf32> to vector<2x8x8xf32>
    %67 = vector.extract_strided_slice %42 {offsets = [0, 88], sizes = [16, 8], strides = [1, 1]} : vector<16x96xf32> to vector<16x8xf32>
    %68 = vector.shape_cast %67 : vector<16x8xf32> to vector<2x8x8xf32>
    %69 = tpu.concatenate %62, %64, %66, %68 in 0 : vector<2x8x8xf32>, vector<2x8x8xf32>, vector<2x8x8xf32>, vector<2x8x8xf32> -> vector<8x8x8xf32>
    "tpu.trace_start"() <{level = 10 : i32, message = "nqd,nkd->nqk"}> : () -> ()
    %cst_7 = arith.constant dense<0.000000e+00> : vector<8x8x8xf32>
    %70 = tpu.matmul %51, %60, %cst_7 {dimension_numbers = #tpu.dot_dimension_numbers<[2], [2], [1], [1], [0, 0, 0, 1, 1, 1], [0], [0]>} : vector<8x8x8xf32>, vector<8x8x8xf32>, vector<8x8x8xf32> -> vector<8x8x8xf32>
    "tpu.trace_stop"() : () -> ()
    %cst_8 = arith.constant 0.353553385 : f32
    %71 = vector.broadcast %cst_8 : f32 to vector<8x8x8xf32>
    %72 = arith.mulf %70, %71 : vector<8x8x8xf32>
    %cst_9 = arith.constant dense<0xFF800000> : vector<8x8xf32>
    %73 = vector.multi_reduction <maximumf>, %72, %cst_9 [2] : vector<8x8x8xf32> to vector<8x8xf32>
    %74 = vector.shape_cast %73 : vector<8x8xf32> to vector<8x8x1xf32>
    %75 = vector.broadcast %74 : vector<8x8x1xf32> to vector<8x8x8xf32>
    %76 = arith.subf %72, %75 : vector<8x8x8xf32>
    %77 = math.exp %76 : vector<8x8x8xf32>
    %cst_10 = arith.constant dense<0.000000e+00> : vector<8x8xf32>
    %78 = vector.multi_reduction <add>, %77, %cst_10 [2] : vector<8x8x8xf32> to vector<8x8xf32>
    %79 = vector.shape_cast %78 : vector<8x8xf32> to vector<8x8x1xf32>
    %80 = tpu.reciprocal %79 {approx = true} : vector<8x8x1xf32> -> vector<8x8x1xf32>
    %81 = vector.broadcast %80 : vector<8x8x1xf32> to vector<8x8x8xf32>
    %82 = arith.mulf %77, %81 : vector<8x8x8xf32>
    "tpu.trace_start"() <{level = 10 : i32, message = "nqk,nkd->nqd"}> : () -> ()
    %cst_11 = arith.constant dense<0.000000e+00> : vector<8x8x8xf32>
    %83 = tpu.matmul %82, %69, %cst_11 {dimension_numbers = #tpu.dot_dimension_numbers<[2], [1], [1], [2], [0, 0, 0, 1, 1, 2], [0], [0]>} : vector<8x8x8xf32>, vector<8x8x8xf32>, vector<8x8x8xf32> -> vector<8x8x8xf32>
    "tpu.trace_stop"() : () -> ()
    %84 = vector.extract_strided_slice %83 {offsets = [0, 0, 0], sizes = [2, 8, 8], strides = [1, 1, 1]} : vector<8x8x8xf32> to vector<2x8x8xf32>
    %85 = vector.shape_cast %84 : vector<2x8x8xf32> to vector<16x8xf32>
    %86 = vector.extract_strided_slice %83 {offsets = [2, 0, 0], sizes = [2, 8, 8], strides = [1, 1, 1]} : vector<8x8x8xf32> to vector<2x8x8xf32>
    %87 = vector.shape_cast %86 : vector<2x8x8xf32> to vector<16x8xf32>
    %88 = vector.extract_strided_slice %83 {offsets = [4, 0, 0], sizes = [2, 8, 8], strides = [1, 1, 1]} : vector<8x8x8xf32> to vector<2x8x8xf32>
    %89 = vector.shape_cast %88 : vector<2x8x8xf32> to vector<16x8xf32>
    %90 = vector.extract_strided_slice %83 {offsets = [6, 0, 0], sizes = [2, 8, 8], strides = [1, 1, 1]} : vector<8x8x8xf32> to vector<2x8x8xf32>
    %91 = vector.shape_cast %90 : vector<2x8x8xf32> to vector<16x8xf32>
    %92 = tpu.concatenate %85, %87, %89, %91 in 1 : vector<16x8xf32>, vector<16x8xf32>, vector<16x8xf32>, vector<16x8xf32> -> vector<16x32xf32>
    %c0_12 = arith.constant 0 : index
    %c0_13 = arith.constant 0 : index
    %c0_14 = arith.constant 0 : index
    %93 = vector.load %arg3[%c0_12, %c0_13, %c0_14] : memref<2x32x32xf32, #tpu.memory_space<vmem>>, vector<1x32x32xf32>
    %94 = vector.shape_cast %93 : vector<1x32x32xf32> to vector<32x32xf32>
    %cst_15 = arith.constant dense<0.000000e+00> : vector<16x32xf32>
    %95 = tpu.matmul %92, %94, %cst_15 {dimension_numbers = #tpu.dot_dimension_numbers<[1], [0], [0], [1], [0, 0, 1, 1], [], []>} : vector<16x32xf32>, vector<32x32xf32>, vector<16x32xf32> -> vector<16x32xf32>
    %96 = vector.shape_cast %26 : vector<32xf32> to vector<1x32xf32>
    %97 = vector.broadcast %96 : vector<1x32xf32> to vector<16x32xf32>
    %98 = arith.addf %95, %97 : vector<16x32xf32>
    %99 = arith.addf %18, %98 : vector<16x32xf32>
    %cst_16 = arith.constant dense<0.000000e+00> : vector<16xf32>
    %100 = vector.multi_reduction <add>, %99, %cst_16 [1] : vector<16x32xf32> to vector<16xf32>
    %101 = vector.shape_cast %100 : vector<16xf32> to vector<16x1xf32>
    %cst_17 = arith.constant 3.200000e+01 : f32
    %102 = vector.broadcast %cst_17 : f32 to vector<16x1xf32>
    %103 = arith.divf %101, %102 : vector<16x1xf32>
    %104 = vector.broadcast %103 : vector<16x1xf32> to vector<16x32xf32>
    %105 = arith.subf %99, %104 : vector<16x32xf32>
    %106 = arith.mulf %105, %105 : vector<16x32xf32>
    %cst_18 = arith.constant dense<0.000000e+00> : vector<16xf32>
    %107 = vector.multi_reduction <add>, %106, %cst_18 [1] : vector<16x32xf32> to vector<16xf32>
    %108 = vector.shape_cast %107 : vector<16xf32> to vector<16x1xf32>
    %cst_19 = arith.constant 3.200000e+01 : f32
    %109 = vector.broadcast %cst_19 : f32 to vector<16x1xf32>
    %110 = arith.divf %108, %109 : vector<16x1xf32>
    %cst_20 = arith.constant 9.99999974E-6 : f32
    %111 = vector.broadcast %cst_20 : f32 to vector<16x1xf32>
    %112 = arith.addf %110, %111 : vector<16x1xf32>
    %113 = math.rsqrt %112 : vector<16x1xf32>
    %114 = vector.broadcast %113 : vector<16x1xf32> to vector<16x32xf32>
    %115 = arith.mulf %105, %114 : vector<16x32xf32>
    %116 = vector.shape_cast %30 : vector<32xf32> to vector<1x32xf32>
    %117 = vector.broadcast %116 : vector<1x32xf32> to vector<16x32xf32>
    %118 = arith.mulf %115, %117 : vector<16x32xf32>
    %119 = vector.shape_cast %32 : vector<32xf32> to vector<1x32xf32>
    %120 = vector.broadcast %119 : vector<1x32xf32> to vector<16x32xf32>
    %121 = arith.addf %118, %120 : vector<16x32xf32>
    %c0_21 = arith.constant 0 : index
    %c0_22 = arith.constant 0 : index
    %c0_23 = arith.constant 0 : index
    %122 = vector.load %arg4[%c0_21, %c0_22, %c0_23] : memref<2x32x64xf32, #tpu.memory_space<vmem>>, vector<1x32x64xf32>
    %123 = vector.shape_cast %122 : vector<1x32x64xf32> to vector<32x64xf32>
    %cst_24 = arith.constant dense<0.000000e+00> : vector<16x64xf32>
    %124 = tpu.matmul %121, %123, %cst_24 {dimension_numbers = #tpu.dot_dimension_numbers<[1], [0], [0], [1], [0, 0, 1, 1], [], []>} : vector<16x32xf32>, vector<32x64xf32>, vector<16x64xf32> -> vector<16x64xf32>
    %125 = vector.shape_cast %24 : vector<64xf32> to vector<1x64xf32>
    %126 = vector.broadcast %125 : vector<1x64xf32> to vector<16x64xf32>
    %127 = arith.addf %124, %126 : vector<16x64xf32>
    %cst_25 = arith.constant 0.000000e+00 : f32
    %128 = vector.broadcast %cst_25 : f32 to vector<16x64xf32>
    %129 = arith.maximumf %127, %128 : vector<16x64xf32>
    %c0_26 = arith.constant 0 : index
    %c0_27 = arith.constant 0 : index
    %c0_28 = arith.constant 0 : index
    %130 = vector.load %arg5[%c0_26, %c0_27, %c0_28] : memref<2x64x32xf32, #tpu.memory_space<vmem>>, vector<1x64x32xf32>
    %131 = vector.shape_cast %130 : vector<1x64x32xf32> to vector<64x32xf32>
    %cst_29 = arith.constant dense<0.000000e+00> : vector<16x32xf32>
    %132 = tpu.matmul %129, %131, %cst_29 {dimension_numbers = #tpu.dot_dimension_numbers<[1], [0], [0], [1], [0, 0, 1, 1], [], []>} : vector<16x64xf32>, vector<64x32xf32>, vector<16x32xf32> -> vector<16x32xf32>
    %133 = vector.shape_cast %28 : vector<32xf32> to vector<1x32xf32>
    %134 = vector.broadcast %133 : vector<1x32xf32> to vector<16x32xf32>
    %135 = arith.addf %132, %134 : vector<16x32xf32>
    %136 = arith.addf %121, %135 : vector<16x32xf32>
    %cst_30 = arith.constant dense<0.000000e+00> : vector<16xf32>
    %137 = vector.multi_reduction <add>, %136, %cst_30 [1] : vector<16x32xf32> to vector<16xf32>
    %138 = vector.shape_cast %137 : vector<16xf32> to vector<16x1xf32>
    %cst_31 = arith.constant 3.200000e+01 : f32
    %139 = vector.broadcast %cst_31 : f32 to vector<16x1xf32>
    %140 = arith.divf %138, %139 : vector<16x1xf32>
    %141 = vector.broadcast %140 : vector<16x1xf32> to vector<16x32xf32>
    %142 = arith.subf %136, %141 : vector<16x32xf32>
    %143 = arith.mulf %142, %142 : vector<16x32xf32>
    %cst_32 = arith.constant dense<0.000000e+00> : vector<16xf32>
    %144 = vector.multi_reduction <add>, %143, %cst_32 [1] : vector<16x32xf32> to vector<16xf32>
    %145 = vector.shape_cast %144 : vector<16xf32> to vector<16x1xf32>
    %cst_33 = arith.constant 3.200000e+01 : f32
    %146 = vector.broadcast %cst_33 : f32 to vector<16x1xf32>
    %147 = arith.divf %145, %146 : vector<16x1xf32>
    %cst_34 = arith.constant 9.99999974E-6 : f32
    %148 = vector.broadcast %cst_34 : f32 to vector<16x1xf32>
    %149 = arith.addf %147, %148 : vector<16x1xf32>
    %150 = math.rsqrt %149 : vector<16x1xf32>
    %151 = vector.broadcast %150 : vector<16x1xf32> to vector<16x32xf32>
    %152 = arith.mulf %142, %151 : vector<16x32xf32>
    %153 = vector.shape_cast %34 : vector<32xf32> to vector<1x32xf32>
    %154 = vector.broadcast %153 : vector<1x32xf32> to vector<16x32xf32>
    %155 = arith.mulf %152, %154 : vector<16x32xf32>
    %156 = vector.shape_cast %36 : vector<32xf32> to vector<1x32xf32>
    %157 = vector.broadcast %156 : vector<1x32xf32> to vector<16x32xf32>
    %158 = arith.addf %155, %157 : vector<16x32xf32>
    %c1 = arith.constant 1 : index
    %c0_35 = arith.constant 0 : index
    %c0_36 = arith.constant 0 : index
    %159 = vector.load %arg6[%c1, %c0_35, %c0_36] : memref<2x8x96xf32, #tpu.memory_space<vmem>>, vector<1x8x96xf32>
    %160 = vector.shape_cast %159 : vector<1x8x96xf32> to vector<8x96xf32>
    %161 = vector.extract_strided_slice %160 {offsets = [0, 0], sizes = [1, 96], strides = [1, 1]} : vector<8x96xf32> to vector<1x96xf32>
    %162 = vector.shape_cast %161 : vector<1x96xf32> to vector<96xf32>
    %163 = vector.extract_strided_slice %160 {offsets = [1, 0], sizes = [1, 64], strides = [1, 1]} : vector<8x96xf32> to vector<1x64xf32>
    %164 = vector.shape_cast %163 : vector<1x64xf32> to vector<64xf32>
    %165 = vector.extract_strided_slice %160 {offsets = [2, 0], sizes = [1, 32], strides = [1, 1]} : vector<8x96xf32> to vector<1x32xf32>
    %166 = vector.shape_cast %165 : vector<1x32xf32> to vector<32xf32>
    %167 = vector.extract_strided_slice %160 {offsets = [3, 0], sizes = [1, 32], strides = [1, 1]} : vector<8x96xf32> to vector<1x32xf32>
    %168 = vector.shape_cast %167 : vector<1x32xf32> to vector<32xf32>
    %169 = vector.extract_strided_slice %160 {offsets = [4, 0], sizes = [1, 32], strides = [1, 1]} : vector<8x96xf32> to vector<1x32xf32>
    %170 = vector.shape_cast %169 : vector<1x32xf32> to vector<32xf32>
    %171 = vector.extract_strided_slice %160 {offsets = [5, 0], sizes = [1, 32], strides = [1, 1]} : vector<8x96xf32> to vector<1x32xf32>
    %172 = vector.shape_cast %171 : vector<1x32xf32> to vector<32xf32>
    %173 = vector.extract_strided_slice %160 {offsets = [6, 0], sizes = [1, 32], strides = [1, 1]} : vector<8x96xf32> to vector<1x32xf32>
    %174 = vector.shape_cast %173 : vector<1x32xf32> to vector<32xf32>
    %175 = vector.extract_strided_slice %160 {offsets = [7, 0], sizes = [1, 32], strides = [1, 1]} : vector<8x96xf32> to vector<1x32xf32>
    %176 = vector.shape_cast %175 : vector<1x32xf32> to vector<32xf32>
    %c1_37 = arith.constant 1 : index
    %c0_38 = arith.constant 0 : index
    %c0_39 = arith.constant 0 : index
    %177 = vector.load %arg2[%c1_37, %c0_38, %c0_39] : memref<2x32x96xf32, #tpu.memory_space<vmem>>, vector<1x32x96xf32>
    %178 = vector.shape_cast %177 : vector<1x32x96xf32> to vector<32x96xf32>
    %cst_40 = arith.constant dense<0.000000e+00> : vector<16x96xf32>
    %179 = tpu.matmul %158, %178, %cst_40 {dimension_numbers = #tpu.dot_dimension_numbers<[1], [0], [0], [1], [0, 0, 1, 1], [], []>} : vector<16x32xf32>, vector<32x96xf32>, vector<16x96xf32> -> vector<16x96xf32>
    %180 = vector.shape_cast %162 : vector<96xf32> to vector<1x96xf32>
    %181 = vector.broadcast %180 : vector<1x96xf32> to vector<16x96xf32>
    %182 = arith.addf %179, %181 : vector<16x96xf32>
    %183 = vector.extract_strided_slice %182 {offsets = [0, 0], sizes = [16, 8], strides = [1, 1]} : vector<16x96xf32> to vector<16x8xf32>
    %184 = vector.shape_cast %183 : vector<16x8xf32> to vector<2x8x8xf32>
    %185 = vector.extract_strided_slice %182 {offsets = [0, 8], sizes = [16, 8], strides = [1, 1]} : vector<16x96xf32> to vector<16x8xf32>
    %186 = vector.shape_cast %185 : vector<16x8xf32> to vector<2x8x8xf32>
    %187 = vector.extract_strided_slice %182 {offsets = [0, 16], sizes = [16, 8], strides = [1, 1]} : vector<16x96xf32> to vector<16x8xf32>
    %188 = vector.shape_cast %187 : vector<16x8xf32> to vector<2x8x8xf32>
    %189 = vector.extract_strided_slice %182 {offsets = [0, 24], sizes = [16, 8], strides = [1, 1]} : vector<16x96xf32> to vector<16x8xf32>
    %190 = vector.shape_cast %189 : vector<16x8xf32> to vector<2x8x8xf32>
    %191 = tpu.concatenate %184, %186, %188, %190 in 0 : vector<2x8x8xf32>, vector<2x8x8xf32>, vector<2x8x8xf32>, vector<2x8x8xf32> -> vector<8x8x8xf32>
    %192 = vector.extract_strided_slice %182 {offsets = [0, 32], sizes = [16, 8], strides = [1, 1]} : vector<16x96xf32> to vector<16x8xf32>
    %193 = vector.shape_cast %192 : vector<16x8xf32> to vector<2x8x8xf32>
    %194 = vector.extract_strided_slice %182 {offsets = [0, 40], sizes = [16, 8], strides = [1, 1]} : vector<16x96xf32> to vector<16x8xf32>
    %195 = vector.shape_cast %194 : vector<16x8xf32> to vector<2x8x8xf32>
    %196 = vector.extract_strided_slice %182 {offsets = [0, 48], sizes = [16, 8], strides = [1, 1]} : vector<16x96xf32> to vector<16x8xf32>
    %197 = vector.shape_cast %196 : vector<16x8xf32> to vector<2x8x8xf32>
    %198 = vector.extract_strided_slice %182 {offsets = [0, 56], sizes = [16, 8], strides = [1, 1]} : vector<16x96xf32> to vector<16x8xf32>
    %199 = vector.shape_cast %198 : vector<16x8xf32> to vector<2x8x8xf32>
    %200 = tpu.concatenate %193, %195, %197, %199 in 0 : vector<2x8x8xf32>, vector<2x8x8xf32>, vector<2x8x8xf32>, vector<2x8x8xf32> -> vector<8x8x8xf32>
    %201 = vector.extract_strided_slice %182 {offsets = [0, 64], sizes = [16, 8], strides = [1, 1]} : vector<16x96xf32> to vector<16x8xf32>
    %202 = vector.shape_cast %201 : vector<16x8xf32> to vector<2x8x8xf32>
    %203 = vector.extract_strided_slice %182 {offsets = [0, 72], sizes = [16, 8], strides = [1, 1]} : vector<16x96xf32> to vector<16x8xf32>
    %204 = vector.shape_cast %203 : vector<16x8xf32> to vector<2x8x8xf32>
    %205 = vector.extract_strided_slice %182 {offsets = [0, 80], sizes = [16, 8], strides = [1, 1]} : vector<16x96xf32> to vector<16x8xf32>
    %206 = vector.shape_cast %205 : vector<16x8xf32> to vector<2x8x8xf32>
    %207 = vector.extract_strided_slice %182 {offsets = [0, 88], sizes = [16, 8], strides = [1, 1]} : vector<16x96xf32> to vector<16x8xf32>
    %208 = vector.shape_cast %207 : vector<16x8xf32> to vector<2x8x8xf32>
    %209 = tpu.concatenate %202, %204, %206, %208 in 0 : vector<2x8x8xf32>, vector<2x8x8xf32>, vector<2x8x8xf32>, vector<2x8x8xf32> -> vector<8x8x8xf32>
    "tpu.trace_start"() <{level = 10 : i32, message = "nqd,nkd->nqk"}> : () -> ()
    %cst_41 = arith.constant dense<0.000000e+00> : vector<8x8x8xf32>
    %210 = tpu.matmul %191, %200, %cst_41 {dimension_numbers = #tpu.dot_dimension_numbers<[2], [2], [1], [1], [0, 0, 0, 1, 1, 1], [0], [0]>} : vector<8x8x8xf32>, vector<8x8x8xf32>, vector<8x8x8xf32> -> vector<8x8x8xf32>
    "tpu.trace_stop"() : () -> ()
    %cst_42 = arith.constant 0.353553385 : f32
    %211 = vector.broadcast %cst_42 : f32 to vector<8x8x8xf32>
    %212 = arith.mulf %210, %211 : vector<8x8x8xf32>
    %cst_43 = arith.constant dense<0xFF800000> : vector<8x8xf32>
    %213 = vector.multi_reduction <maximumf>, %212, %cst_43 [2] : vector<8x8x8xf32> to vector<8x8xf32>
    %214 = vector.shape_cast %213 : vector<8x8xf32> to vector<8x8x1xf32>
    %215 = vector.broadcast %214 : vector<8x8x1xf32> to vector<8x8x8xf32>
    %216 = arith.subf %212, %215 : vector<8x8x8xf32>
    %217 = math.exp %216 : vector<8x8x8xf32>
    %cst_44 = arith.constant dense<0.000000e+00> : vector<8x8xf32>
    %218 = vector.multi_reduction <add>, %217, %cst_44 [2] : vector<8x8x8xf32> to vector<8x8xf32>
    %219 = vector.shape_cast %218 : vector<8x8xf32> to vector<8x8x1xf32>
    %220 = tpu.reciprocal %219 {approx = true} : vector<8x8x1xf32> -> vector<8x8x1xf32>
    %221 = vector.broadcast %220 : vector<8x8x1xf32> to vector<8x8x8xf32>
    %222 = arith.mulf %217, %221 : vector<8x8x8xf32>
    "tpu.trace_start"() <{level = 10 : i32, message = "nqk,nkd->nqd"}> : () -> ()
    %cst_45 = arith.constant dense<0.000000e+00> : vector<8x8x8xf32>
    %223 = tpu.matmul %222, %209, %cst_45 {dimension_numbers = #tpu.dot_dimension_numbers<[2], [1], [1], [2], [0, 0, 0, 1, 1, 2], [0], [0]>} : vector<8x8x8xf32>, vector<8x8x8xf32>, vector<8x8x8xf32> -> vector<8x8x8xf32>
    "tpu.trace_stop"() : () -> ()
    %224 = vector.extract_strided_slice %223 {offsets = [0, 0, 0], sizes = [2, 8, 8], strides = [1, 1, 1]} : vector<8x8x8xf32> to vector<2x8x8xf32>
    %225 = vector.shape_cast %224 : vector<2x8x8xf32> to vector<16x8xf32>
    %226 = vector.extract_strided_slice %223 {offsets = [2, 0, 0], sizes = [2, 8, 8], strides = [1, 1, 1]} : vector<8x8x8xf32> to vector<2x8x8xf32>
    %227 = vector.shape_cast %226 : vector<2x8x8xf32> to vector<16x8xf32>
    %228 = vector.extract_strided_slice %223 {offsets = [4, 0, 0], sizes = [2, 8, 8], strides = [1, 1, 1]} : vector<8x8x8xf32> to vector<2x8x8xf32>
    %229 = vector.shape_cast %228 : vector<2x8x8xf32> to vector<16x8xf32>
    %230 = vector.extract_strided_slice %223 {offsets = [6, 0, 0], sizes = [2, 8, 8], strides = [1, 1, 1]} : vector<8x8x8xf32> to vector<2x8x8xf32>
    %231 = vector.shape_cast %230 : vector<2x8x8xf32> to vector<16x8xf32>
    %232 = tpu.concatenate %225, %227, %229, %231 in 1 : vector<16x8xf32>, vector<16x8xf32>, vector<16x8xf32>, vector<16x8xf32> -> vector<16x32xf32>
    %c1_46 = arith.constant 1 : index
    %c0_47 = arith.constant 0 : index
    %c0_48 = arith.constant 0 : index
    %233 = vector.load %arg3[%c1_46, %c0_47, %c0_48] : memref<2x32x32xf32, #tpu.memory_space<vmem>>, vector<1x32x32xf32>
    %234 = vector.shape_cast %233 : vector<1x32x32xf32> to vector<32x32xf32>
    %cst_49 = arith.constant dense<0.000000e+00> : vector<16x32xf32>
    %235 = tpu.matmul %232, %234, %cst_49 {dimension_numbers = #tpu.dot_dimension_numbers<[1], [0], [0], [1], [0, 0, 1, 1], [], []>} : vector<16x32xf32>, vector<32x32xf32>, vector<16x32xf32> -> vector<16x32xf32>
    %236 = vector.shape_cast %166 : vector<32xf32> to vector<1x32xf32>
    %237 = vector.broadcast %236 : vector<1x32xf32> to vector<16x32xf32>
    %238 = arith.addf %235, %237 : vector<16x32xf32>
    %239 = arith.addf %158, %238 : vector<16x32xf32>
    %cst_50 = arith.constant dense<0.000000e+00> : vector<16xf32>
    %240 = vector.multi_reduction <add>, %239, %cst_50 [1] : vector<16x32xf32> to vector<16xf32>
    %241 = vector.shape_cast %240 : vector<16xf32> to vector<16x1xf32>
    %cst_51 = arith.constant 3.200000e+01 : f32
    %242 = vector.broadcast %cst_51 : f32 to vector<16x1xf32>
    %243 = arith.divf %241, %242 : vector<16x1xf32>
    %244 = vector.broadcast %243 : vector<16x1xf32> to vector<16x32xf32>
    %245 = arith.subf %239, %244 : vector<16x32xf32>
    %246 = arith.mulf %245, %245 : vector<16x32xf32>
    %cst_52 = arith.constant dense<0.000000e+00> : vector<16xf32>
    %247 = vector.multi_reduction <add>, %246, %cst_52 [1] : vector<16x32xf32> to vector<16xf32>
    %248 = vector.shape_cast %247 : vector<16xf32> to vector<16x1xf32>
    %cst_53 = arith.constant 3.200000e+01 : f32
    %249 = vector.broadcast %cst_53 : f32 to vector<16x1xf32>
    %250 = arith.divf %248, %249 : vector<16x1xf32>
    %cst_54 = arith.constant 9.99999974E-6 : f32
    %251 = vector.broadcast %cst_54 : f32 to vector<16x1xf32>
    %252 = arith.addf %250, %251 : vector<16x1xf32>
    %253 = math.rsqrt %252 : vector<16x1xf32>
    %254 = vector.broadcast %253 : vector<16x1xf32> to vector<16x32xf32>
    %255 = arith.mulf %245, %254 : vector<16x32xf32>
    %256 = vector.shape_cast %170 : vector<32xf32> to vector<1x32xf32>
    %257 = vector.broadcast %256 : vector<1x32xf32> to vector<16x32xf32>
    %258 = arith.mulf %255, %257 : vector<16x32xf32>
    %259 = vector.shape_cast %172 : vector<32xf32> to vector<1x32xf32>
    %260 = vector.broadcast %259 : vector<1x32xf32> to vector<16x32xf32>
    %261 = arith.addf %258, %260 : vector<16x32xf32>
    %c1_55 = arith.constant 1 : index
    %c0_56 = arith.constant 0 : index
    %c0_57 = arith.constant 0 : index
    %262 = vector.load %arg4[%c1_55, %c0_56, %c0_57] : memref<2x32x64xf32, #tpu.memory_space<vmem>>, vector<1x32x64xf32>
    %263 = vector.shape_cast %262 : vector<1x32x64xf32> to vector<32x64xf32>
    %cst_58 = arith.constant dense<0.000000e+00> : vector<16x64xf32>
    %264 = tpu.matmul %261, %263, %cst_58 {dimension_numbers = #tpu.dot_dimension_numbers<[1], [0], [0], [1], [0, 0, 1, 1], [], []>} : vector<16x32xf32>, vector<32x64xf32>, vector<16x64xf32> -> vector<16x64xf32>
    %265 = vector.shape_cast %164 : vector<64xf32> to vector<1x64xf32>
    %266 = vector.broadcast %265 : vector<1x64xf32> to vector<16x64xf32>
    %267 = arith.addf %264, %266 : vector<16x64xf32>
    %cst_59 = arith.constant 0.000000e+00 : f32
    %268 = vector.broadcast %cst_59 : f32 to vector<16x64xf32>
    %269 = arith.maximumf %267, %268 : vector<16x64xf32>
    %c1_60 = arith.constant 1 : index
    %c0_61 = arith.constant 0 : index
    %c0_62 = arith.constant 0 : index
    %270 = vector.load %arg5[%c1_60, %c0_61, %c0_62] : memref<2x64x32xf32, #tpu.memory_space<vmem>>, vector<1x64x32xf32>
    %271 = vector.shape_cast %270 : vector<1x64x32xf32> to vector<64x32xf32>
    %cst_63 = arith.constant dense<0.000000e+00> : vector<16x32xf32>
    %272 = tpu.matmul %269, %271, %cst_63 {dimension_numbers = #tpu.dot_dimension_numbers<[1], [0], [0], [1], [0, 0, 1, 1], [], []>} : vector<16x64xf32>, vector<64x32xf32>, vector<16x32xf32> -> vector<16x32xf32>
    %273 = vector.shape_cast %168 : vector<32xf32> to vector<1x32xf32>
    %274 = vector.broadcast %273 : vector<1x32xf32> to vector<16x32xf32>
    %275 = arith.addf %272, %274 : vector<16x32xf32>
    %276 = arith.addf %261, %275 : vector<16x32xf32>
    %cst_64 = arith.constant dense<0.000000e+00> : vector<16xf32>
    %277 = vector.multi_reduction <add>, %276, %cst_64 [1] : vector<16x32xf32> to vector<16xf32>
    %278 = vector.shape_cast %277 : vector<16xf32> to vector<16x1xf32>
    %cst_65 = arith.constant 3.200000e+01 : f32
    %279 = vector.broadcast %cst_65 : f32 to vector<16x1xf32>
    %280 = arith.divf %278, %279 : vector<16x1xf32>
    %281 = vector.broadcast %280 : vector<16x1xf32> to vector<16x32xf32>
    %282 = arith.subf %276, %281 : vector<16x32xf32>
    %283 = arith.mulf %282, %282 : vector<16x32xf32>
    %cst_66 = arith.constant dense<0.000000e+00> : vector<16xf32>
    %284 = vector.multi_reduction <add>, %283, %cst_66 [1] : vector<16x32xf32> to vector<16xf32>
    %285 = vector.shape_cast %284 : vector<16xf32> to vector<16x1xf32>
    %cst_67 = arith.constant 3.200000e+01 : f32
    %286 = vector.broadcast %cst_67 : f32 to vector<16x1xf32>
    %287 = arith.divf %285, %286 : vector<16x1xf32>
    %cst_68 = arith.constant 9.99999974E-6 : f32
    %288 = vector.broadcast %cst_68 : f32 to vector<16x1xf32>
    %289 = arith.addf %287, %288 : vector<16x1xf32>
    %290 = math.rsqrt %289 : vector<16x1xf32>
    %291 = vector.broadcast %290 : vector<16x1xf32> to vector<16x32xf32>
    %292 = arith.mulf %282, %291 : vector<16x32xf32>
    %293 = vector.shape_cast %174 : vector<32xf32> to vector<1x32xf32>
    %294 = vector.broadcast %293 : vector<1x32xf32> to vector<16x32xf32>
    %295 = arith.mulf %292, %294 : vector<16x32xf32>
    %296 = vector.shape_cast %176 : vector<32xf32> to vector<1x32xf32>
    %297 = vector.broadcast %296 : vector<1x32xf32> to vector<16x32xf32>
    %298 = arith.addf %295, %297 : vector<16x32xf32>
    %299 = vector.shape_cast %298 : vector<16x32xf32> to vector<2x8x32xf32>
    %300 = vector.extract_strided_slice %299 {offsets = [0, 0, 0], sizes = [2, 1, 32], strides = [1, 1, 1]} : vector<2x8x32xf32> to vector<2x1x32xf32>
    %301 = vector.shape_cast %300 : vector<2x1x32xf32> to vector<2x32xf32>
    %302 = vector.extract_strided_slice %299 {offsets = [0, 1, 0], sizes = [2, 1, 32], strides = [1, 1, 1]} : vector<2x8x32xf32> to vector<2x1x32xf32>
    %303 = vector.shape_cast %302 : vector<2x1x32xf32> to vector<2x32xf32>
    %304 = vector.extract_strided_slice %299 {offsets = [0, 2, 0], sizes = [2, 1, 32], strides = [1, 1, 1]} : vector<2x8x32xf32> to vector<2x1x32xf32>
    %305 = vector.shape_cast %304 : vector<2x1x32xf32> to vector<2x32xf32>
    %306 = vector.extract_strided_slice %299 {offsets = [0, 3, 0], sizes = [2, 1, 32], strides = [1, 1, 1]} : vector<2x8x32xf32> to vector<2x1x32xf32>
    %307 = vector.shape_cast %306 : vector<2x1x32xf32> to vector<2x32xf32>
    %308 = vector.extract_strided_slice %299 {offsets = [0, 4, 0], sizes = [2, 1, 32], strides = [1, 1, 1]} : vector<2x8x32xf32> to vector<2x1x32xf32>
    %309 = vector.shape_cast %308 : vector<2x1x32xf32> to vector<2x32xf32>
    %310 = vector.extract_strided_slice %299 {offsets = [0, 5, 0], sizes = [2, 1, 32], strides = [1, 1, 1]} : vector<2x8x32xf32> to vector<2x1x32xf32>
    %311 = vector.shape_cast %310 : vector<2x1x32xf32> to vector<2x32xf32>
    %312 = vector.extract_strided_slice %299 {offsets = [0, 6, 0], sizes = [2, 1, 32], strides = [1, 1, 1]} : vector<2x8x32xf32> to vector<2x1x32xf32>
    %313 = vector.shape_cast %312 : vector<2x1x32xf32> to vector<2x32xf32>
    %314 = vector.extract_strided_slice %299 {offsets = [0, 7, 0], sizes = [2, 1, 32], strides = [1, 1, 1]} : vector<2x8x32xf32> to vector<2x1x32xf32>
    %315 = vector.shape_cast %314 : vector<2x1x32xf32> to vector<2x32xf32>
    %316 = tpu.concatenate %301, %303, %305, %307, %309, %311, %313, %315 in 1 : vector<2x32xf32>, vector<2x32xf32>, vector<2x32xf32>, vector<2x32xf32>, vector<2x32xf32>, vector<2x32xf32>, vector<2x32xf32>, vector<2x32xf32> -> vector<2x256xf32>
    %c0_69 = arith.constant 0 : index
    %c0_70 = arith.constant 0 : index
    %317 = vector.load %arg7[%c0_69, %c0_70] : memref<2x256xf32, #tpu.memory_space<vmem>>, vector<2x256xf32>
    tpu.vector_store %arg7[%c0_69, %c0_70], %316 {strides = array<i32>} : memref<2x256xf32, #tpu.memory_space<vmem>>, vector<2x256xf32>,
    return
  }
  func.func @transform_0(%arg0: i32) -> (i32, i32) {
    %c0_i32 = arith.constant 0 : i32
    %c0_i32_0 = arith.constant 0 : i32
    return %arg0, %c0_i32 : i32, i32
  }
  func.func @transform_1(%arg0: i32) -> (i32, i32, i32) {
    %c0_i32 = arith.constant 0 : i32
    %c0_i32_0 = arith.constant 0 : i32
    %c0_i32_1 = arith.constant 0 : i32
    %c0_i32_2 = arith.constant 0 : i32
    return %c0_i32, %c0_i32_0, %c0_i32_1 : i32, i32, i32
  }
  func.func @transform_2(%arg0: i32) -> (i32, i32, i32) {
    %c0_i32 = arith.constant 0 : i32
    %c0_i32_0 = arith.constant 0 : i32
    %c0_i32_1 = arith.constant 0 : i32
    %c0_i32_2 = arith.constant 0 : i32
    return %c0_i32, %c0_i32_0, %c0_i32_1 : i32, i32, i32
  }
  func.func @transform_3(%arg0: i32) -> (i32, i32, i32) {
    %c0_i32 = arith.constant 0 : i32
    %c0_i32_0 = arith.constant 0 : i32
    %c0_i32_1 = arith.constant 0 : i32
    %c0_i32_2 = arith.constant 0 : i32
    return %c0_i32, %c0_i32_0, %c0_i32_1 : i32, i32, i32
  }
  func.func @transform_4(%arg0: i32) -> (i32, i32, i32) {
    %c0_i32 = arith.constant 0 : i32
    %c0_i32_0 = arith.constant 0 : i32
    %c0_i32_1 = arith.constant 0 : i32
    %c0_i32_2 = arith.constant 0 : i32
    return %c0_i32, %c0_i32_0, %c0_i32_1 : i32, i32, i32
  }
  func.func @transform_5(%arg0: i32) -> (i32, i32, i32) {
    %c0_i32 = arith.constant 0 : i32
    %c0_i32_0 = arith.constant 0 : i32
    %c0_i32_1 = arith.constant 0 : i32
    %c0_i32_2 = arith.constant 0 : i32
    return %c0_i32, %c0_i32_0, %c0_i32_1 : i32, i32, i32
  }
  func.func @transform_6(%arg0: i32) -> (i32, i32) {
    %c0_i32 = arith.constant 0 : i32
    %c0_i32_0 = arith.constant 0 : i32
    return %arg0, %c0_i32 : i32, i32
  }
}

</mosaic_0001>

<bundles_post_ra>
// kernel: tpu_custom_call.1
= control target key start
LH: loop header
LB: loop body
LE: loop exit
PB: predicated region body
PF: predicated region fallthrough
CT: control target
= control target key end

     0   :  { %11 = vsyncpa [#allocation3], 0  ;;  %s5257_s0 = inlined_call_operand.hbm [shape: f32[2,256], index: 0, kind: input, shape index: {}]   ;;  %s5258_s1 = inlined_call_operand.vmem [shape: f32[2,32,96], index: 1, kind: input, shape index: {}]   ;;  %s5259_s2 = inlined_call_operand.vmem [shape: f32[2,32,32], index: 2, kind: input, shape index: {}]   ;;  %s5260_s3 = inlined_call_operand.vmem [shape: f32[2,32,64], index: 3, kind: input, shape index: {}]   ;;  %s5261_s4 = inlined_call_operand.vmem [shape: f32[2,64,32], index: 4, kind: input, shape index: {}]   ;;  %s5262_s5 = inlined_call_operand.vmem [shape: f32[2,8,96], index: 5, kind: input, shape index: {}]   ;;  %s5263_s6 = inlined_call_operand.hbm [shape: f32[2,256], index: 6, kind: output, shape index: {}]  }
   0x1   :  { %12 = vsyncpa [#allocation4], 0  ;;  %s4535_s21 = smov [#allocation2]   ;;  %s4487_s25 = scalar_lea.hbm %s5257_s0, 64 }
   0x2   :  { %s19_s22 = sshll.u32 %s4535_s21, 4  ;;  %p4488_p0 = scmp.ne.s32.totalorder %s5257_s0, %s4487_s25  ;;  %s20_s22 = int_to_ptr.vmem [resolvable:$true] %s19_s22 }
   0x3   :  { %p4491_p1 = scmp.lt.u32.totalorder %s4487_s25, %s5257_s0 }
   0x5   :  { %p4493_p2 = pnand %p4491_p1, %p4488_p0 }
   0x7   :  { %4496 = shalt.err (!%p4493_p2)
}
   0x8   :  { %s4497_s30 = scalar_lea.vmem %s20_s22, 64  ;;  %p4502_p4 = scmp.lt.s32.totalorder %s20_s22, %s20_s22 }
   0x9   :  { %p4498_p3 = scmp.ne.s32.totalorder %s20_s22, %s4497_s30  ;;  %p4503_p5 = scmp.lt.s32.totalorder %s4497_s30, %s4497_s30 }
   0xb   :  { %p4504_p6 = por %p4503_p5, %p4502_p4 }
   0xd   :  { %p4505_p7 = pnand %p4504_p6, %p4498_p3 }
   0xf   :  { %4508 = shalt.err (!%p4505_p7)
}
  0x10   :  { %22 = dma.hbm_to_vmem [thread:$0]  %s5257_s0, 64, %s20_s22, [#allocation3]  }
  0x11   :  { %4531 = dma.done.wait [#allocation3], 64  }
  0x12   :  { %4532 = vsyncadd [#allocation3], 4294967232  ;;  %v68_v0 = vlaneseq  ;;  %v3843_v3 = vld.sshfl [vmem:[#allocation2] sm:$0x33 pattern:$0x75316420] }
  0x13   :  { %s4536_s9 = smov 64   ;;  %s4537_s10 = smov 96   ;;  %v45_v5 = vcombine.high %v3843_v3, %v3843_v3  ;;  %v156_v6 = vld [vmem:[%s5258_s1] sm:$0xff]  ;;  %v157_v7 = vld [vmem:[%s5258_s1 + $0x8] sm:$0xff]  ;;  %v158_v9 = vld [vmem:[%s5258_s1 + $0x10] sm:$0xff]  ;;  %v48_v19 = vrot.slane %v3843_v3, 1 }
  0x14   :  { %v4595_v1 = vshrl.u32 %v68_v0, 7  ;;  %56 = vrot.lane.b32.xlu1 %v3843_v3, %s4536_s9  ;;  %50 = vrot.lane.b32.xlu0 %v3843_v3, %s4537_s10  ;;  %v4314_v8 = vpack.c.bf16 %v157_v7, %v156_v6  ;;  %v159_v10 = vld [vmem:[%s5258_s1 + $0x18] sm:$0xff]  ;;  %s4538_s18 = smov 32   ;;  %vm134_vm0 = vcmask 1040384   ;;  %vm137_vm1 = vcmask 1041408   ;;  %v4659_v55 = vld [vmem:[%s5262_s5] sm:$0xff] }
  0x15   :  { %v4318_v11 = vpack.c.bf16 %v159_v10, %v158_v9  ;;  %v49_v23 = vrot.slane %v45_v5, 1  ;;  %vm140_vm2 = vcmask 1042432   ;;  %vm143_vm3 = vcmask 1043456   ;;  %s4540_s21 = smov 120   ;;  %s4542_s22 = smov 112  }
  0x16   :  { %v4598_v2 = vsub.s32 0, %v4595_v1  ;;  %4315 = vmatprep.subr.bf16.mxu1 %v4314_v8  ;;  %vm146_vm4 = vcmask 1044480   ;;  %vm149_vm5 = vcmask 1045504   ;;  %vm152_vm6 = vcmask 1046528   ;;  %s4543_s23 = smov 104   ;;  %s4544_s8 = smov 8  }
  0x17   :  { %4317 = vmatpush3.bf16.msra.mxu1 %v4314_v8  ;;  %vm164_vm7 = vcmask 261120   ;;  %v4539_v61 = vmov 0.0   ;;  %vm4541_vm8 = vmmov 0   ;;  %vm262_vm9 = vcmask 64512   ;;  %s4545_s11 = smov 16   ;;  %s4546_s0 = smov 24  }
  0x18   :  { %v71_v4 = vrot.slane %v3843_v3, %v4598_v2  ;;  %52 = vrot.lane.b32.xlu1 %v45_v5, %s4537_s10  ;;  %v75_v12 = vrot.slane %v45_v5, %v4598_v2  ;;  %4319 = vmatprep.subr.bf16.mxu1 %v4318_v11  ;;  %v97_v25 = vrot.slane %v48_v19, %v4598_v2  ;;  %vm1599_vm10 = vcmask 130048  }
  0x19   :  { %v101_v34 = vrot.slane %v49_v23, %v4598_v2  ;;  %v163_v56 = vrot.slane %v4659_v55, %v4598_v2  ;;  %4071 = vmatprep.subr.mxu0 %v4539_v61  ;;  %4073 = vmatprep.mubr.msk.f32.mxu0 %vm4541_vm8, %v4539_v61  ;;  %vm1602_vm11 = vcmask 195584   ;;  %vm1838_vm12 = vcmask 523264  }
  0x1a   :  { %76 = vrot.lane.b32.xlu0 %v71_v4, %s4537_s10  ;;  %vm3767_vm13 = vcmask 1041409   ;;  %vm3811_vm14 = vcmask 785408  }
  0x1b   :  { %4321 = vmatpush3.bf16.msra.mxu1 %v4318_v11 }
  0x1c   :  { %82 = vrot.lane.b32.xlu1 %v71_v4, %s4536_s9  ;;  %4061 = vmatprep.subr.mxu1 %v4539_v61 }
  0x1e   :  { %58 = vrot.lane.b32.xlu0 %v45_v5, %s4536_s9 }
  0x20   :  { %62 = vrot.lane.b32.xlu1 %v3843_v3, %s4538_s18 }
  0x22   :  { %78 = vrot.lane.b32.xlu0 %v75_v12, %s4537_s10 }
  0x24   :  { %88 = vrot.lane.b32.xlu1 %v71_v4, %s4538_s18 }
  0x26   :  { %84 = vrot.lane.b32.xlu0 %v75_v12, %s4536_s9 }
  0x28   :  { %90 = vrot.lane.b32.xlu1 %v75_v12, %s4538_s18 }
  0x2a   :  { %64 = vrot.lane.b32.xlu0 %v45_v5, %s4538_s18 }
  0x86   :  { %v57_v13 = vpop.permute.xlu1 %56  ;;  %v51_v14 = vpop.permute.xlu0 %50 }
  0x87   :  { %v54_v22 = vrot.slane %v51_v14, 1  ;;  %v60_v24 = vrot.slane %v57_v13, 1 }
  0x89   :  { %v107_v31 = vrot.slane %v54_v22, %v4598_v2  ;;  %v117_v35 = vrot.slane %v60_v24, %v4598_v2 }
  0x8a   :  { %v53_v16 = vpop.permute.xlu1 %52 }
  0x8b   :  { %v55_v32 = vrot.slane %v53_v16, 1 }
  0x8c   :  { %v77_v15 = vpop.permute.xlu0 %76 }
  0x8d   :  { %v135_v26 = vsel %vm134_vm0, %v3843_v3, %v77_v15  ;;  %v111_v45 = vrot.slane %v55_v32, %v4598_v2 }
  0x8e   :  { %v83_v18 = vpop.permute.xlu1 %82 }
  0x8f   :  { %v138_v28 = vsel %vm137_vm1, %v135_v26, %v83_v18 }
  0x90   :  { %v59_v17 = vpop.permute.xlu0 %58 }
  0x91   :  { %v61_v36 = vrot.slane %v59_v17, 1 }
  0x92   :  { %v63_v20 = vpop.permute.xlu1 %62 }
  0x93   :  { %v66_v27 = vrot.slane %v63_v20, 1  ;;  %v121_v49 = vrot.slane %v61_v36, %v4598_v2 }
  0x94   :  { %v79_v21 = vpop.permute.xlu0 %78 }
  0x95   :  { %v127_v38 = vrot.slane %v66_v27, %v4598_v2  ;;  %v136_v39 = vsel %vm134_vm0, %v45_v5, %v79_v21 }
  0x96   :  { %v89_v29 = vpop.permute.xlu1 %88 }
  0x97   :  { %v141_v33 = vsel %vm140_vm2, %v138_v28, %v89_v29 }
  0x98   :  { %v85_v30 = vpop.permute.xlu0 %84  ;;  %v144_v37 = vsel %vm143_vm3, %v141_v33, %v97_v25 }
  0x99   :  { %v147_v40 = vsel %vm146_vm4, %v144_v37, %v107_v31  ;;  %v139_v41 = vsel %vm137_vm1, %v136_v39, %v85_v30 }
  0x9a   :  { %v91_v42 = vpop.permute.xlu1 %90  ;;  %v150_v44 = vsel %vm149_vm5, %v147_v40, %v117_v35 }
  0x9b   :  { %v142_v46 = vsel %vm140_vm2, %v139_v41, %v91_v42  ;;  %v4642_v48 = vsel %vm152_vm6, %v150_v44, %v127_v38 }
  0x9c   :  { %v65_v43 = vpop.permute.xlu0 %64  ;;  %v145_v50 = vsel %vm143_vm3, %v142_v46, %v101_v34  ;;  %4058 = vmatprep.mubr.msk.f32.mxu1 %vm164_vm7, %v4642_v48 }
  0x9d   :  { %v67_v47 = vrot.slane %v65_v43, 1  ;;  %v148_v51 = vsel %vm146_vm4, %v145_v50, %v111_v45 }
  0x9e   :  { %v151_v53 = vsel %vm149_vm5, %v148_v51, %v121_v49 }
  0x9f   :  { %v131_v52 = vrot.slane %v67_v47, %v4598_v2 }
  0xa1   :  { %v4652_v54 = vsel %vm152_vm6, %v151_v53, %v131_v52 }
  0xa2   :  { %4059 = vmatmul.mubr.msk.f32.vlgmr.msra.gmra.mrb[0].mxu1 %vm164_vm7, %v4652_v54 }
  0xa3   :  { %4063 = vmatprep.mubr.msk.f32.mxu1 %vm4541_vm8, %v4539_v61 }
 0x175   :  { %v4060_v57 = vpop.f32.mrb[0].mxu1 }
 0x176   :  { %v4663_v58 = vadd.f32 %v4060_v57, %v163_v56  ;;  %v237_v59 = vpop.f32.mrb[1].mxu1 }
 0x177   :  { %v4665_v60 = vadd.f32 %v237_v59, %v163_v56 }
 0x178   :  { %250 = vrot.lane.b32.xlu1 %v4663_v58, %s4540_s21 }
 0x179   :  { %248 = vrot.lane.b32.xlu0 %v4665_v60, %s4540_s21 }
 0x17c   :  { %254 = vrot.lane.b32.xlu1 %v4663_v58, %s4542_s22 }
 0x17d   :  { %252 = vrot.lane.b32.xlu0 %v4665_v60, %s4542_s22 }
 0x180   :  { %258 = vrot.lane.b32.xlu1 %v4663_v58, %s4543_s23 }
 0x181   :  { %256 = vrot.lane.b32.xlu0 %v4665_v60, %s4543_s23 }
 0x184   :  { %337 = vrot.lane.b32.xlu1 %v4663_v58, %s4537_s10 }
 0x185   :  { %260 = vrot.lane.b32.xlu0 %v4665_v60, %s4537_s10 }
 0x1ea   :  { %v4689_v62 = vpop.permute.xlu1 %250 }
 0x1eb   :  { %489 = vrot.lane.b32.xlu1 %v4689_v62, %s4537_s10  ;;  %v4693_v63 = vpop.permute.xlu0 %248 }
 0x1ec   :  { %413 = vrot.lane.b32.xlu0 %v4693_v63, %s4537_s10 }
 0x1ee   :  { %v4697_v0 = vpop.permute.xlu1 %254 }
 0x1ef   :  { %641 = vrot.lane.b32.xlu1 %v4697_v0, %s4537_s10  ;;  %v4701_v3 = vpop.permute.xlu0 %252 }
 0x1f0   :  { %565 = vrot.lane.b32.xlu0 %v4701_v3, %s4537_s10 }
 0x1f2   :  { %v4705_v4 = vpop.permute.xlu1 %258 }
 0x1f3   :  { %793 = vrot.lane.b32.xlu1 %v4705_v4, %s4537_s10  ;;  %v4709_v5 = vpop.permute.xlu0 %256 }
 0x1f4   :  { %717 = vrot.lane.b32.xlu0 %v4709_v5, %s4537_s10 }
 0x1f6   :  { %v338_v7 = vpop.permute.xlu1 %337 }
 0x1f7   :  { %v261_v6 = vpop.permute.xlu0 %260 }
 0x1f8   :  { %4062 = vmatpush3.xpose.msk.msra.mxu1 %vm262_vm9, %v261_v6 }
 0x1f9   :  { %4066 = vmatprep.subr.mxu1 %v4539_v61 }
 0x1fb   :  { %4064 = vmatmul.mubr.msk.f32.vlgmr.msra.gmra.mrb[2].mxu1 %vm262_vm9, %v4665_v60 }
 0x1fc   :  { %4067 = vmatpush3.xpose.msk.msra.mxu1 %vm262_vm9, %v338_v7  ;;  %4068 = vmatprep.mubr.msk.f32.mxu1 %vm4541_vm8, %v4539_v61 }
 0x1fd   :  { %4076 = vmatprep.subr.mxu1 %v4539_v61 }
 0x1ff   :  { %4069 = vmatmul.mubr.msk.f32.vlgmr.msra.gmra.mrb[4].mxu1 %vm262_vm9, %v4663_v58 }
 0x200   :  { %4078 = vmatprep.mubr.msk.f32.mxu1 %vm4541_vm8, %v4539_v61 }
 0x25d   :  { %v490_v8 = vpop.permute.xlu1 %489 }
 0x25e   :  { %4077 = vmatpush3.xpose.msk.msra.mxu1 %vm262_vm9, %v490_v8  ;;  %v414_v9 = vpop.permute.xlu0 %413 }
 0x25f   :  { %4072 = vmatpush3.xpose.msk.msra.mxu0 %vm262_vm9, %v414_v9  ;;  %4086 = vmatprep.subr.mxu1 %v4539_v61 }
 0x260   :  { %4081 = vmatprep.subr.mxu0 %v4539_v61 }
 0x261   :  { %v642_v10 = vpop.permute.xlu1 %641  ;;  %4079 = vmatmul.mubr.msk.f32.vlgmr.msra.gmra.mrb[6].mxu1 %vm262_vm9, %v4689_v62 }
 0x262   :  { %4074 = vmatmul.mubr.msk.f32.vlgmr.msra.gmra.mrb[0].mxu0 %vm262_vm9, %v4693_v63  ;;  %4087 = vmatpush3.xpose.msk.msra.mxu1 %vm262_vm9, %v642_v10  ;;  %v566_v11 = vpop.permute.xlu0 %565 }
 0x263   :  { %4082 = vmatpush3.xpose.msk.msra.mxu0 %vm262_vm9, %v566_v11  ;;  %4088 = vmatprep.mubr.msk.f32.mxu1 %vm4541_vm8, %v4539_v61 }
 0x264   :  { %4083 = vmatprep.mubr.msk.f32.mxu0 %vm4541_vm8, %v4539_v61  ;;  %4096 = vmatprep.subr.mxu1 %v4539_v61 }
 0x265   :  { %v794_v12 = vpop.permute.xlu1 %793  ;;  %4089 = vmatmul.mubr.msk.f32.vlgmr.msra.gmra.mrb[8].mxu1 %vm262_vm9, %v4697_v0  ;;  %4091 = vmatprep.subr.mxu0 %v4539_v61 }
 0x266   :  { %4084 = vmatmul.mubr.msk.f32.vlgmr.msra.gmra.mrb[2].mxu0 %vm262_vm9, %v4701_v3  ;;  %4097 = vmatpush3.xpose.msk.msra.mxu1 %vm262_vm9, %v794_v12  ;;  %v718_v13 = vpop.permute.xlu0 %717 }
 0x267   :  { %4092 = vmatpush3.xpose.msk.msra.mxu0 %vm262_vm9, %v718_v13  ;;  %4098 = vmatprep.mubr.msk.f32.mxu1 %vm4541_vm8, %v4539_v61 }
 0x268   :  { %4093 = vmatprep.mubr.msk.f32.mxu0 %vm4541_vm8, %v4539_v61  ;;  %4101 = vmatprep.subr.mxu0 %v4539_v61 }
 0x269   :  { %4099 = vmatmul.mubr.msk.f32.vlgmr.msra.gmra.mrb[10].mxu1 %vm262_vm9, %v4705_v4  ;;  %4106 = vmatprep.subr.mxu1 %v4539_v61 }
 0x26a   :  { %4094 = vmatmul.mubr.msk.f32.vlgmr.msra.gmra.mrb[4].mxu0 %vm262_vm9, %v4709_v5  ;;  %4108 = vmatprep.mubr.msk.f32.mxu1 %vm4541_vm8, %v4539_v61 }
 0x26b   :  { %4103 = vmatprep.mubr.msk.f32.mxu0 %vm4541_vm8, %v4539_v61 }
 0x2ce   :  { %v333_v14 = vpop.f32.mrb[2].mxu1 }
 0x2cf   :  { %v869_v15 = vmul.f32 0.35355338, %v333_v14  ;;  %v4065_v16 = vpop.f32.mrb[3].mxu1 }
 0x2d1   :  { %v877_v17 = vsel %vm262_vm9, %v869_v15, -inf }
 0x2d2   :  { %878 = vmax.xlane.f32.xlu0 %v877_v17  ;;  %v409_v18 = vpop.f32.mrb[4].mxu1 }
 0x2d3   :  { %v870_v19 = vmul.f32 0.35355338, %v409_v18  ;;  %v4070_v20 = vpop.f32.mrb[5].mxu1 }
 0x2d5   :  { %v880_v21 = vsel %vm262_vm9, %v870_v19, -inf }
 0x2d6   :  { %881 = vmax.xlane.f32.xlu1 %v880_v21 }
 0x334   :  { %v561_v22 = vpop.f32.mrb[6].mxu1 }
 0x335   :  { %v485_v23 = vpop.f32.mrb[0].mxu0  ;;  %v4080_v24 = vpop.f32.mrb[7].mxu1  ;;  %v872_v27 = vmul.f32 0.35355338, %v561_v22 }
 0x336   :  { %v871_v25 = vmul.f32 0.35355338, %v485_v23  ;;  %v4075_v26 = vpop.f32.mrb[1].mxu0 }
 0x337   :  { %v886_v36 = vsel %vm262_vm9, %v872_v27, -inf }
 0x338   :  { %v713_v28 = vpop.f32.mrb[8].mxu1  ;;  %v883_v29 = vsel %vm262_vm9, %v871_v25, -inf }
 0x339   :  { %v4090_v30 = vpop.f32.mrb[9].mxu1  ;;  %884 = vmax.xlane.f32.xlu0 %v883_v29  ;;  %v637_v31 = vpop.f32.mrb[2].mxu0  ;;  %v874_v34 = vmul.f32 0.35355338, %v713_v28 }
 0x33a   :  { %v873_v32 = vmul.f32 0.35355338, %v637_v31  ;;  %v4085_v33 = vpop.f32.mrb[3].mxu0 }
 0x33b   :  { %v892_v43 = vsel %vm262_vm9, %v874_v34, -inf }
 0x33c   :  { %v865_v35 = vpop.f32.mrb[10].mxu1  ;;  %v889_v37 = vsel %vm262_vm9, %v873_v32, -inf }
 0x33d   :  { %v4100_v38 = vpop.f32.mrb[11].mxu1  ;;  %887 = vmax.xlane.f32.xlu0 %v886_v36  ;;  %890 = vmax.xlane.f32.xlu1 %v889_v37  ;;  %v789_v39 = vpop.f32.mrb[4].mxu0  ;;  %v876_v42 = vmul.f32 0.35355338, %v865_v35 }
 0x33e   :  { %v875_v40 = vmul.f32 0.35355338, %v789_v39  ;;  %v4095_v41 = vpop.f32.mrb[5].mxu0 }
 0x33f   :  { %v898_v45 = vsel %vm262_vm9, %v876_v42, -inf }
 0x340   :  { %v895_v44 = vsel %vm262_vm9, %v875_v40, -inf }
 0x341   :  { %893 = vmax.xlane.f32.xlu0 %v892_v43  ;;  %896 = vmax.xlane.f32.xlu1 %v895_v44 }
 0x345   :  { %899 = vmax.xlane.f32.xlu0 %v898_v45 }
 0x352   :  { %965 = vrot.lane.b32.xlu1 %v4665_v60, %s4536_s9 }
 0x356   :  { %1117 = vrot.lane.b32.xlu1 %v4693_v63, %s4536_s9 }
 0x35a   :  { %1193 = vrot.lane.b32.xlu1 %v4689_v62, %s4536_s9 }
 0x35b   :  { %1041 = vrot.lane.b32.xlu0 %v4663_v58, %s4536_s9 }
 0x35e   :  { %1345 = vrot.lane.b32.xlu1 %v4697_v0, %s4536_s9 }
 0x35f   :  { %1269 = vrot.lane.b32.xlu0 %v4701_v3, %s4536_s9  ;;  %v879_v49 = vpop.xlane.xlu0 %878 }
 0x360   :  { %v901_v50 = vsub.f32 %v869_v15, %v879_v49 }
 0x362   :  { %v909_v52 = vmul.f32 1.442695, %v901_v50 }
 0x363   :  { %v882_v46 = vpop.xlane.xlu1 %881 }
 0x364   :  { %v902_v47 = vsub.f32 %v870_v19, %v882_v46 }
 0x366   :  { %v911_v51 = vmul.f32 1.442695, %v902_v47 }
 0x368   :  { %4407 = vpow2.f32 %v911_v51 }
 0x369   :  { %4409 = vpow2.f32 %v909_v52 }
 0x372   :  { %v4781_v53 = vpop.eup %4407 }
 0x373   :  { %v928_v56 = vsel %vm262_vm9, %v4781_v53, 0.0  ;;  %v4785_v57 = vpop.eup %4409 }
 0x374   :  { %v925_v58 = vsel %vm262_vm9, %v4785_v57, 0.0 }
 0x37e   :  { %929 = vadd.xlane.f32.xlu0 %v928_v56 }
 0x382   :  { %926 = vadd.xlane.f32.xlu1 %v925_v58 }
 0x3c6   :  { %v885_v59 = vpop.xlane.xlu0 %884 }
 0x3c7   :  { %v903_v60 = vsub.f32 %v871_v25, %v885_v59 }
 0x3c9   :  { %v913_v62 = vmul.f32 1.442695, %v903_v60 }
 0x3ca   :  { %v891_v63 = vpop.xlane.xlu1 %890  ;;  %v888_v0 = vpop.xlane.xlu0 %887 }
 0x3cb   :  { %4411 = vpow2.f32 %v913_v62  ;;  %v905_v3 = vsub.f32 %v873_v32, %v891_v63  ;;  %v904_v6 = vsub.f32 %v872_v27, %v888_v0 }
 0x3cd   :  { %v917_v7 = vmul.f32 1.442695, %v905_v3  ;;  %v915_v8 = vmul.f32 1.442695, %v904_v6 }
 0x3ce   :  { %v897_v9 = vpop.xlane.xlu1 %896  ;;  %v894_v10 = vpop.xlane.xlu0 %893 }
 0x3cf   :  { %4413 = vpow2.f32 %v917_v7  ;;  %v907_v11 = vsub.f32 %v875_v40, %v897_v9  ;;  %v906_v12 = vsub.f32 %v874_v34, %v894_v10  ;;  %v1606_v9 = vld [vmem:[%s5259_s2 + $0x8] sm:$0xff] }
 0x3d0   :  { %4415 = vpow2.f32 %v915_v8  ;;  %v1605_v8 = vld [vmem:[%s5259_s2] sm:$0xff] }
 0x3d1   :  { %v921_v13 = vmul.f32 1.442695, %v907_v11  ;;  %v919_v14 = vmul.f32 1.442695, %v906_v12  ;;  %v4322_v10 = vpack.c.bf16 %v1606_v9, %v1605_v8  ;;  %v1607_v11 = vld [vmem:[%s5259_s2 + $0x10] sm:$0xff]  ;;  %v1608_v12 = vld [vmem:[%s5259_s2 + $0x18] sm:$0xff] }
 0x3d2   :  { %v966_v15 = vpop.permute.xlu1 %965  ;;  %v900_v16 = vpop.xlane.xlu0 %899  ;;  %v1829_v8 = vld [vmem:[%s5261_s4 + $0x18] sm:$0xff] }
 0x3d3   :  { %4417 = vpow2.f32 %v921_v13  ;;  %v908_v17 = vsub.f32 %v876_v42, %v900_v16  ;;  %4102 = vmatpush3.msra.mxu0 %v966_v15  ;;  %v4326_v13 = vpack.c.bf16 %v1608_v12, %v1607_v11  ;;  %v1831_v11 = vld [vmem:[%s5261_s4 + $0x28] sm:$0xff] }
 0x3d4   :  { %4419 = vpow2.f32 %v919_v14  ;;  %4111 = vmatprep.subr.mxu0 %v4539_v61 }
 0x3d5   :  { %v4412_v18 = vpop.eup %4411  ;;  %v923_v19 = vmul.f32 1.442695, %v908_v17 }
 0x3d6   :  { %v1042_v20 = vpop.permute.xlu0 %1041  ;;  %v931_v21 = vsel %vm262_vm9, %v4412_v18, 0.0  ;;  %v1118_v32 = vpop.permute.xlu1 %1117 }
 0x3d7   :  { %4421 = vpow2.f32 %v923_v19  ;;  %932 = vadd.xlane.f32.xlu1 %v931_v21  ;;  %4107 = vmatpush3.msra.mxu1 %v1042_v20 }
 0x3d8   :  { %4116 = vmatprep.subr.mxu1 %v4539_v61 }
 0x3d9   :  { %v4414_v22 = vpop.eup %4413 }
 0x3da   :  { %v4416_v23 = vpop.eup %4415  ;;  %v937_v24 = vsel %vm262_vm9, %v4414_v22, 0.0  ;;  %v1194_v33 = vpop.permute.xlu1 %1193 }
 0x3db   :  { %938 = vadd.xlane.f32.xlu1 %v937_v24  ;;  %v934_v25 = vsel %vm262_vm9, %v4416_v23, 0.0  ;;  %v1270_v34 = vpop.permute.xlu0 %1269 }
 0x3dc   :  { %935 = vadd.xlane.f32.xlu0 %v934_v25 }
 0x3dd   :  { %v4418_v26 = vpop.eup %4417 }
 0x3de   :  { %v4420_v27 = vpop.eup %4419  ;;  %v943_v28 = vsel %vm262_vm9, %v4418_v26, 0.0  ;;  %v1346_v35 = vpop.permute.xlu1 %1345 }
 0x3df   :  { %944 = vadd.xlane.f32.xlu1 %v943_v28  ;;  %v940_v29 = vsel %vm262_vm9, %v4420_v27, 0.0 }
 0x3e0   :  { %941 = vadd.xlane.f32.xlu0 %v940_v29 }
 0x3e1   :  { %v4796_v30 = vpop.eup %4421 }
 0x3e2   :  { %v946_v31 = vsel %vm262_vm9, %v4796_v30, 0.0 }
 0x3e4   :  { %947 = vadd.xlane.f32.xlu0 %v946_v31 }
 0x3f0   :  { %1497 = vrot.lane.b32.xlu1 %v4705_v4, %s4536_s9 }
 0x3fa   :  { %1421 = vrot.lane.b32.xlu0 %v4709_v5, %s4536_s9 }
 0x40b   :  { %v930_v36 = vpop.xlane.xlu0 %929 }
 0x40c   :  { %4423 = vrcp.f32 %v930_v36 }
 0x40f   :  { %v927_v37 = vpop.xlane.xlu1 %926 }
 0x410   :  { %4425 = vrcp.f32 %v927_v37 }
 0x416   :  { %v4424_v38 = vpop.eup %4423 }
 0x417   :  { %v958_v39 = vmul.f32 %v4424_v38, %v4781_v53  ;;  %v1611_v38 = vsub.s32 2, %v4595_v1 }
 0x419   :  { %4109 = vmatmul.mubr.msk.f32.vlgmr.msra.gmra.mrb[12].mxu1 %vm262_vm9, %v958_v39  ;;  %v1612_v39 = vrot.slane %v4659_v55, %v1611_v38 }
 0x41a   :  { %v4426_v40 = vpop.eup %4425  ;;  %4117 = vmatpush3.msra.mxu1 %v1194_v33  ;;  %4118 = vmatprep.mubr.msk.f32.mxu1 %vm4541_vm8, %v4539_v61 }
 0x41b   :  { %v957_v4 = vmul.f32 %v4426_v40, %v4785_v57  ;;  %4126 = vmatprep.subr.mxu1 %v4539_v61 }
 0x41d   :  { %4104 = vmatmul.mubr.msk.f32.vlgmr.msra.gmra.mrb[6].mxu0 %vm262_vm9, %v957_v4 }
 0x41e   :  { %4112 = vmatpush3.msra.mxu0 %v1118_v32  ;;  %4113 = vmatprep.mubr.msk.f32.mxu0 %vm4541_vm8, %v4539_v61 }
 0x41f   :  { %4121 = vmatprep.subr.mxu0 %v4539_v61 }
 0x464   :  { %v933_v5 = vpop.xlane.xlu1 %932 }
 0x465   :  { %4427 = vrcp.f32 %v933_v5 }
 0x468   :  { %v939_v41 = vpop.xlane.xlu1 %938 }
 0x469   :  { %4429 = vrcp.f32 %v939_v41  ;;  %v936_v42 = vpop.xlane.xlu0 %935 }
 0x46a   :  { %4431 = vrcp.f32 %v936_v42 }
 0x46c   :  { %v945_v43 = vpop.xlane.xlu1 %944 }
 0x46d   :  { %4433 = vrcp.f32 %v945_v43  ;;  %v942_v44 = vpop.xlane.xlu0 %941 }
 0x46e   :  { %4435 = vrcp.f32 %v942_v44 }
 0x46f   :  { %v4428_v45 = vpop.eup %4427 }
 0x470   :  { %v959_v46 = vmul.f32 %v4428_v45, %v4412_v18  ;;  %v1498_v60 = vpop.permute.xlu1 %1497 }
 0x471   :  { %v948_v47 = vpop.xlane.xlu0 %947 }
 0x472   :  { %4437 = vrcp.f32 %v948_v47  ;;  %4114 = vmatmul.mubr.msk.f32.vlgmr.msra.gmra.mrb[8].mxu0 %vm262_vm9, %v959_v46 }
 0x473   :  { %v4430_v49 = vpop.eup %4429  ;;  %4122 = vmatpush3.msra.mxu0 %v1270_v34  ;;  %4123 = vmatprep.mubr.msk.f32.mxu0 %vm4541_vm8, %v4539_v61 }
 0x474   :  { %v4432_v50 = vpop.eup %4431  ;;  %v961_v51 = vmul.f32 %v4430_v49, %v4414_v22  ;;  %4131 = vmatprep.subr.mxu0 %v4539_v61 }
 0x475   :  { %v960_v52 = vmul.f32 %v4432_v50, %v4416_v23  ;;  %v1422_v53 = vpop.permute.xlu0 %1421 }
 0x476   :  { %4124 = vmatmul.mubr.msk.f32.vlgmr.msra.gmra.mrb[10].mxu0 %vm262_vm9, %v961_v51 }
 0x477   :  { %v4434_v56 = vpop.eup %4433  ;;  %4119 = vmatmul.mubr.msk.f32.vlgmr.msra.gmra.mrb[14].mxu1 %vm262_vm9, %v960_v52  ;;  %4132 = vmatpush3.msra.mxu0 %v1422_v53 }
 0x478   :  { %v4436_v57 = vpop.eup %4435  ;;  %v963_v58 = vmul.f32 %v4434_v56, %v4418_v26  ;;  %4127 = vmatpush3.msra.mxu1 %v1346_v35  ;;  %4128 = vmatprep.mubr.msk.f32.mxu1 %vm4541_vm8, %v4539_v61 }
 0x479   :  { %v962_v59 = vmul.f32 %v4436_v57, %v4420_v27  ;;  %4133 = vmatprep.mubr.msk.f32.mxu0 %vm4541_vm8, %v4539_v61  ;;  %4136 = vmatprep.subr.mxu1 %v4539_v61 }
 0x47a   :  { %4134 = vmatmul.mubr.msk.f32.vlgmr.msra.gmra.mrb[12].mxu0 %vm262_vm9, %v963_v58  ;;  %4323 = vmatprep.subr.bf16.mxu0 %v4322_v10  ;;  %v1736_v58 = vld [vmem:[%s5260_s3 + $0x8] sm:$0xff] }
 0x47b   :  { %4129 = vmatmul.mubr.msk.f32.vlgmr.msra.gmra.mrb[16].mxu1 %vm262_vm9, %v962_v59  ;;  %4325 = vmatpush3.bf16.msra.mxu0 %v4322_v10  ;;  %v1830_v10 = vld [vmem:[%s5261_s4 + $0x20] sm:$0xff] }
 0x47c   :  { %v4438_v62 = vpop.eup %4437  ;;  %4137 = vmatpush3.msra.mxu1 %v1498_v60  ;;  %4138 = vmatprep.mubr.msk.f32.mxu1 %vm4541_vm8, %v4539_v61  ;;  %v1737_v60 = vld [vmem:[%s5260_s3 + $0x10] sm:$0xff]  ;;  %v4346_v12 = vpack.c.bf16 %v1831_v11, %v1830_v10 }
 0x47d   :  { %v964_v63 = vmul.f32 %v4438_v62, %v4796_v30  ;;  %4327 = vmatprep.subr.bf16.mxu0 %v4326_v13  ;;  %v1738_v62 = vld [vmem:[%s5260_s3 + $0x18] sm:$0xff] }
 0x47f   :  { %4139 = vmatmul.mubr.msk.f32.vlgmr.msra.gmra.mrb[18].mxu1 %vm262_vm9, %v964_v63  ;;  %4329 = vmatpush3.bf16.msra.mxu0 %v4326_v13  ;;  %v4334_v63 = vpack.c.bf16 %v1738_v62, %v1737_v60 }
 0x4ec   :  { %v1113_v0 = vpop.f32.mrb[12].mxu1 }
 0x4ed   :  { %v4110_v3 = vpop.f32.mrb[13].mxu1 }
 0x4ee   :  { %v1827_v3 = vld [vmem:[%s5261_s4 + $0x8] sm:$0xff] }
 0x4f0   :  { %v1037_v6 = vpop.f32.mrb[6].mxu0 }
 0x4f1   :  { %v4105_v7 = vpop.f32.mrb[7].mxu0 }
 0x545   :  { %v1189_v14 = vpop.f32.mrb[8].mxu0 }
 0x546   :  { %v4115_v15 = vpop.f32.mrb[9].mxu0  ;;  %1575 = vrot.lane.b32.xlu0 %v1189_v14, %s4544_s8 }
 0x549   :  { %v1341_v16 = vpop.f32.mrb[10].mxu0 }
 0x54a   :  { %v1265_v17 = vpop.f32.mrb[14].mxu1  ;;  %1583 = vrot.lane.b32.xlu0 %v1341_v16, %s4545_s11  ;;  %v4125_v18 = vpop.f32.mrb[11].mxu0 }
 0x54b   :  { %1577 = vrot.lane.b32.xlu1 %v1265_v17, %s4544_s8  ;;  %v4120_v19 = vpop.f32.mrb[15].mxu1 }
 0x54c   :  { %v1725_v19 = vsub.s32 4, %v4595_v1 }
 0x54d   :  { %v1493_v20 = vpop.f32.mrb[12].mxu0 }
 0x54e   :  { %v1417_v21 = vpop.f32.mrb[16].mxu1  ;;  %1591 = vrot.lane.b32.xlu0 %v1493_v20, %s4546_s0  ;;  %v4135_v22 = vpop.f32.mrb[13].mxu0  ;;  %v1731_v20 = vsub.s32 5, %v4595_v1 }
 0x54f   :  { %1585 = vrot.lane.b32.xlu1 %v1417_v21, %s4545_s11  ;;  %v4130_v23 = vpop.f32.mrb[17].mxu1  ;;  %v1726_v21 = vrot.slane %v4659_v55, %v1725_v19 }
 0x552   :  { %v1569_v24 = vpop.f32.mrb[18].mxu1 }
 0x553   :  { %1593 = vrot.lane.b32.xlu1 %v1569_v24, %s4546_s0  ;;  %v4140_v25 = vpop.f32.mrb[19].mxu1  ;;  %v1732_v24 = vrot.slane %v4659_v55, %v1731_v20 }
 0x5b8   :  { %v1576_v26 = vpop.permute.xlu0 %1575 }
 0x5b9   :  { %v1597_v29 = vsel %vm262_vm9, %v1037_v6, %v1576_v26  ;;  %v1828_v6 = vld [vmem:[%s5261_s4 + $0x10] sm:$0xff] }
 0x5ba   :  { %v4342_v9 = vpack.c.bf16 %v1829_v8, %v1828_v6  ;;  %v3879_v6 = vld [vmem:[%s5258_s1 + $0x30] sm:$0xff] }
 0x5bc   :  { %v1584_v27 = vpop.permute.xlu0 %1583 }
 0x5bd   :  { %v1578_v28 = vpop.permute.xlu1 %1577  ;;  %v1600_v30 = vsel %vm1599_vm10, %v1597_v29, %v1584_v27 }
 0x5be   :  { %v1598_v34 = vsel %vm262_vm9, %v1113_v0, %v1578_v28  ;;  %v1826_v0 = vld [vmem:[%s5261_s4] sm:$0xff] }
 0x5bf   :  { %v4338_v7 = vpack.c.bf16 %v1827_v3, %v1826_v0  ;;  %v3878_v0 = vld [vmem:[%s5258_s1 + $0x28] sm:$0xff] }
 0x5c0   :  { %v1592_v31 = vpop.permute.xlu0 %1591 }
 0x5c1   :  { %v1586_v32 = vpop.permute.xlu1 %1585  ;;  %v1603_v33 = vsel %vm1602_vm11, %v1600_v30, %v1592_v31  ;;  %4339 = vmatprep.subr.bf16.mxu0 %v4338_v7  ;;  %v1832_v31 = vld [vmem:[%s5261_s4 + $0x30] sm:$0xff] }
 0x5c2   :  { %4149 = vmatprep.mubr.msk.f32.mxu0 %vm164_vm7, %v1603_v33  ;;  %v1601_v35 = vsel %vm1599_vm10, %v1598_v34, %v1586_v32  ;;  %v1833_v32 = vld [vmem:[%s5261_s4 + $0x38] sm:$0xff]  ;;  %v1741_v34 = vsub.s32 1, %v4595_v1 }
 0x5c3   :  { %v4350_v33 = vpack.c.bf16 %v1833_v32, %v1832_v31 }
 0x5c5   :  { %v1594_v36 = vpop.permute.xlu1 %1593 }
 0x5c6   :  { %v1604_v37 = vsel %vm1602_vm11, %v1601_v35, %v1594_v36  ;;  %v1742_v35 = vrot.slane %v4659_v55, %v1741_v34 }
 0x5c7   :  { %4150 = vmatmul.mubr.msk.f32.vlgmr.msra.gmra.mrb[14].mxu0 %vm164_vm7, %v1604_v37 }
 0x5c8   :  { %4341 = vmatpush3.bf16.msra.mxu0 %v4338_v7  ;;  %v3880_v7 = vld [vmem:[%s5258_s1 + $0x38] sm:$0xff] }
 0x5c9   :  { %4343 = vmatprep.subr.bf16.mxu0 %v4342_v9  ;;  %v4358_v8 = vpack.c.bf16 %v3880_v7, %v3879_v6 }
 0x5cc   :  { %4345 = vmatpush3.bf16.msra.mxu0 %v4342_v9 }
 0x5cd   :  { %4347 = vmatprep.subr.bf16.mxu0 %v4346_v12 }
 0x5d0   :  { %4349 = vmatpush3.bf16.msra.mxu0 %v4346_v12 }
 0x5d1   :  { %4351 = vmatprep.subr.bf16.mxu0 %v4350_v33 }
 0x5d4   :  { %4353 = vmatpush3.bf16.msra.mxu0 %v4350_v33 }
 0x5d5   :  { %4203 = vmatprep.subr.mxu0 %v4539_v61 }
 0x69a   :  { %v4151_v40 = vpop.f32.mrb[14].mxu0 }
 0x69b   :  { %v1691_v4 = vadd.f32 %v4151_v40, %v1612_v39  ;;  %v1685_v5 = vpop.f32.mrb[15].mxu0 }
 0x69c   :  { %v1686_v41 = vadd.f32 %v1685_v5, %v1612_v39 }
 0x69d   :  { %v1695_v42 = vadd.f32 %v1691_v4, %v4652_v54 }
 0x69e   :  { %v1694_v43 = vadd.f32 %v1686_v41, %v4642_v48  ;;  %v1735_v48 = vld [vmem:[%s5260_s3] sm:$0xff]  ;;  %v1836_v41 = vsub.s32 3, %v4595_v1 }
 0x69f   :  { %v1699_v44 = vsel %vm164_vm7, %v1695_v42, 0.0  ;;  %v4330_v59 = vpack.c.bf16 %v1736_v58, %v1735_v48 }
 0x6a0   :  { %1700 = vadd.xlane.f32.xlu1 %v1699_v44  ;;  %v1696_v45 = vsel %vm164_vm7, %v1694_v43, 0.0 }
 0x6a1   :  { %1697 = vadd.xlane.f32.xlu0 %v1696_v45  ;;  %4331 = vmatprep.subr.bf16.mxu1 %v4330_v59 }
 0x6a2   :  { %4333 = vmatpush3.bf16.msra.mxu1 %v4330_v59 }
 0x6a3   :  { %4335 = vmatprep.subr.bf16.mxu1 %v4334_v63 }
 0x6a6   :  { %4337 = vmatpush3.bf16.msra.mxu1 %v4334_v63  ;;  %v3877_v63 = vld [vmem:[%s5258_s1 + $0x20] sm:$0xff] }
 0x6a7   :  { %v4354_v3 = vpack.c.bf16 %v3878_v0, %v3877_v63 }
 0x6a9   :  { %4355 = vmatprep.subr.bf16.mxu1 %v4354_v3 }
 0x72d   :  { %v1701_v46 = vpop.xlane.xlu1 %1700 }
 0x72e   :  { %v1704_v47 = vmul.f32 0.03125, %v1701_v46  ;;  %v1698_v49 = vpop.xlane.xlu0 %1697 }
 0x72f   :  { %v1703_v50 = vmul.f32 0.03125, %v1698_v49 }
 0x730   :  { %v1706_v51 = vsub.f32 %v1695_v42, %v1704_v47  ;;  %v1837_v42 = vrot.slane %v4659_v55, %v1836_v41 }
 0x731   :  { %v1705_v52 = vsub.f32 %v1694_v43, %v1703_v50 }
 0x732   :  { %v1708_v57 = vmul.f32 %v1706_v51, %v1706_v51 }
 0x733   :  { %v1707_v53 = vmul.f32 %v1705_v52, %v1705_v52 }
 0x734   :  { %v1712_v54 = vsel %vm164_vm7, %v1708_v57, 0.0 }
 0x735   :  { %v1709_v56 = vsel %vm164_vm7, %v1707_v53, 0.0 }
 0x736   :  { %1710 = vadd.xlane.f32.xlu0 %v1709_v56 }
 0x73a   :  { %1713 = vadd.xlane.f32.xlu0 %v1712_v54 }
 0x7c3   :  { %v1711_v13 = vpop.xlane.xlu0 %1710 }
 0x7c4   :  { %v1715_v14 = vmul.f32 0.03125, %v1711_v13 }
 0x7c6   :  { %v1717_v15 = vadd.f32 1e-05, %v1715_v14 }
 0x7c7   :  { %v1714_v16 = vpop.xlane.xlu0 %1713 }
 0x7c8   :  { %4439 = vrsqrt.f32 %v1717_v15  ;;  %v1716_v17 = vmul.f32 0.03125, %v1714_v16  ;;  %v1950_v15 = vsub.s32 6, %v4595_v1  ;;  %v1956_v16 = vsub.s32 7, %v4595_v1 }
 0x7ca   :  { %v1718_v18 = vadd.f32 1e-05, %v1716_v17  ;;  %v1951_v17 = vrot.slane %v4659_v55, %v1950_v15 }
 0x7cc   :  { %4441 = vrsqrt.f32 %v1718_v18 }
 0x7d2   :  { %v4440_v22 = vpop.eup %4439 }
 0x7d3   :  { %v1721_v23 = vmul.f32 %v4440_v22, %v1705_v52 }
 0x7d5   :  { %v1727_v25 = vmul.f32 %v1726_v21, %v1721_v23 }
 0x7d6   :  { %v4442_v26 = vpop.eup %4441 }
 0x7d7   :  { %v1722_v27 = vmul.f32 %v4442_v26, %v1706_v51  ;;  %v1733_v28 = vadd.f32 %v1732_v24, %v1727_v25 }
 0x7d9   :  { %v1728_v29 = vmul.f32 %v1726_v21, %v1722_v27  ;;  %4160 = vmatprep.mubr.msk.f32.mxu1 %vm164_vm7, %v1733_v28 }
 0x7db   :  { %v1734_v30 = vadd.f32 %v1732_v24, %v1728_v29  ;;  %v1957_v24 = vrot.slane %v4659_v55, %v1956_v16  ;;  %v4964_v29 = vld [vmem:[%s5262_s5 + $0x8] sm:$0xff] }
 0x7dc   :  { %v1970_v55 = vrot.slane %v4964_v29, %v4598_v2 }
 0x7dd   :  { %4161 = vmatmul.mubr.msk.f32.vlgmr.msra.gmra.mrb[20].mxu1 %vm164_vm7, %v1734_v30 }
 0x7de   :  { %4357 = vmatpush3.bf16.msra.mxu1 %v4354_v3 }
 0x7df   :  { %4359 = vmatprep.subr.bf16.mxu1 %v4358_v8 }
 0x7e2   :  { %4361 = vmatpush3.bf16.msra.mxu1 %v4358_v8 }
 0x7e3   :  { %4193 = vmatprep.subr.mxu1 %v4539_v61 }
 0x8b0   :  { %v4162_v36 = vpop.f32.mrb[20].mxu1 }
 0x8b1   :  { %v1821_v37 = vadd.f32 %v4162_v36, %v1742_v35  ;;  %v1815_v39 = vpop.f32.mrb[21].mxu1 }
 0x8b2   :  { %v1816_v40 = vadd.f32 %v1815_v39, %v1742_v35 }
 0x8b3   :  { %v1825_v5 = vmax.f32 %v1821_v37, 0.0 }
 0x8b4   :  { %v1824_v4 = vmax.f32 %v1816_v40, 0.0 }
 0x8b6   :  { %4179 = vmatprep.mubr.msk.f32.mxu0 %vm1838_vm12, %v1824_v4 }
 0x8b7   :  { %4180 = vmatmul.mubr.msk.f32.vlgmr.msra.gmra.mrb[16].mxu0 %vm1838_vm12, %v1825_v5 }
 0x8b8   :  { %4205 = vmatprep.mubr.msk.f32.mxu0 %vm4541_vm8, %v4539_v61 }
 0x98a   :  { %v4181_v43 = vpop.f32.mrb[16].mxu0 }
 0x98b   :  { %v1917_v44 = vadd.f32 %v4181_v43, %v1837_v42  ;;  %v1911_v45 = vpop.f32.mrb[17].mxu0 }
 0x98c   :  { %v1912_v46 = vadd.f32 %v1911_v45, %v1837_v42 }
 0x98d   :  { %v1921_v47 = vadd.f32 %v1917_v44, %v1734_v30 }
 0x98e   :  { %v1920_v49 = vadd.f32 %v1912_v46, %v1733_v28 }
 0x98f   :  { %v1925_v50 = vsel %vm164_vm7, %v1921_v47, 0.0 }
 0x990   :  { %1926 = vadd.xlane.f32.xlu0 %v1925_v50  ;;  %v1922_v51 = vsel %vm164_vm7, %v1920_v49, 0.0 }
 0x991   :  { %1923 = vadd.xlane.f32.xlu1 %v1922_v51 }
 0xa1d   :  { %v1927_v52 = vpop.xlane.xlu0 %1926 }
 0xa1e   :  { %v1929_v53 = vmul.f32 0.03125, %v1927_v52  ;;  %v1924_v56 = vpop.xlane.xlu1 %1923 }
 0xa1f   :  { %v1928_v57 = vmul.f32 0.03125, %v1924_v56 }
 0xa20   :  { %v1931_v54 = vsub.f32 %v1921_v47, %v1929_v53 }
 0xa21   :  { %v1930_v48 = vsub.f32 %v1920_v49, %v1928_v57 }
 0xa22   :  { %v1933_v58 = vmul.f32 %v1931_v54, %v1931_v54 }
 0xa23   :  { %v1932_v59 = vmul.f32 %v1930_v48, %v1930_v48 }
 0xa24   :  { %v1937_v60 = vsel %vm164_vm7, %v1933_v58, 0.0 }
 0xa25   :  { %1938 = vadd.xlane.f32.xlu0 %v1937_v60  ;;  %v1934_v62 = vsel %vm164_vm7, %v1932_v59, 0.0 }
 0xa26   :  { %1935 = vadd.xlane.f32.xlu1 %v1934_v62 }
 0xab2   :  { %v1939_v9 = vpop.xlane.xlu0 %1938 }
 0xab3   :  { %v1941_v10 = vmul.f32 0.03125, %v1939_v9  ;;  %v1936_v11 = vpop.xlane.xlu1 %1935 }
 0xab4   :  { %v1940_v12 = vmul.f32 0.03125, %v1936_v11 }
 0xab5   :  { %v1943_v13 = vadd.f32 1e-05, %v1941_v10 }
 0xab6   :  { %v1942_v14 = vadd.f32 1e-05, %v1940_v12 }
 0xab7   :  { %4443 = vrsqrt.f32 %v1943_v13 }
 0xab8   :  { %4445 = vrsqrt.f32 %v1942_v14 }
 0xac1   :  { %v4444_v18 = vpop.eup %4443 }
 0xac2   :  { %v4446_v21 = vpop.eup %4445  ;;  %v1947_v22 = vmul.f32 %v4444_v18, %v1931_v54 }
 0xac3   :  { %v1946_v23 = vmul.f32 %v4446_v21, %v1930_v48 }
 0xac4   :  { %v1953_v25 = vmul.f32 %v1951_v17, %v1947_v22 }
 0xac5   :  { %v1952_v26 = vmul.f32 %v1951_v17, %v1946_v23 }
 0xac6   :  { %v4953_v28 = vadd.f32 %v1957_v24, %v1953_v25 }
 0xac7   :  { %v4951_v27 = vadd.f32 %v1957_v24, %v1952_v26 }
 0xac9   :  { %4190 = vmatprep.mubr.msk.f32.mxu1 %vm164_vm7, %v4951_v27 }
 0xaca   :  { %4191 = vmatmul.mubr.msk.f32.vlgmr.msra.gmra.mrb[22].mxu1 %vm164_vm7, %v4953_v28 }
 0xacb   :  { %4195 = vmatprep.mubr.msk.f32.mxu1 %vm4541_vm8, %v4539_v61 }
 0xb9d   :  { %v4192_v30 = vpop.f32.mrb[22].mxu1 }
 0xb9e   :  { %v4968_v31 = vadd.f32 %v4192_v30, %v1970_v55  ;;  %v2043_v32 = vpop.f32.mrb[23].mxu1 }
 0xb9f   :  { %v4970_v33 = vadd.f32 %v2043_v32, %v1970_v55 }
 0xba0   :  { %2056 = vrot.lane.b32.xlu0 %v4968_v31, %s4540_s21 }
 0xba1   :  { %2054 = vrot.lane.b32.xlu1 %v4970_v33, %s4540_s21 }
 0xba4   :  { %2062 = vrot.lane.b32.xlu0 %v4970_v33, %s4543_s23 }
 0xba5   :  { %2058 = vrot.lane.b32.xlu1 %v4970_v33, %s4542_s22 }
 0xba8   :  { %2066 = vrot.lane.b32.xlu0 %v4970_v33, %s4537_s10 }
 0xba9   :  { %2060 = vrot.lane.b32.xlu1 %v4968_v31, %s4542_s22 }
 0xbad   :  { %2064 = vrot.lane.b32.xlu1 %v4968_v31, %s4543_s23 }
 0xbb1   :  { %2142 = vrot.lane.b32.xlu1 %v4968_v31, %s4537_s10 }
 0xc12   :  { %v4988_v2 = vpop.permute.xlu0 %2056 }
 0xc13   :  { %2294 = vrot.lane.b32.xlu1 %v4988_v2, %s4537_s10  ;;  %v4992_v35 = vpop.permute.xlu1 %2054 }
 0xc14   :  { %2218 = vrot.lane.b32.xlu0 %v4992_v35, %s4537_s10 }
 0xc16   :  { %v4996_v36 = vpop.permute.xlu0 %2062 }
 0xc17   :  { %v4998_v37 = vpop.permute.xlu1 %2058 }
 0xc18   :  { %2370 = vrot.lane.b32.xlu0 %v4998_v37, %s4537_s10 }
 0xc1a   :  { %v2067_v39 = vpop.permute.xlu0 %2066 }
 0xc1b   :  { %4194 = vmatpush3.xpose.msk.msra.mxu1 %vm262_vm9, %v2067_v39  ;;  %v5003_v40 = vpop.permute.xlu1 %2060 }
 0xc1c   :  { %2522 = vrot.lane.b32.xlu0 %v4996_v36, %s4537_s10  ;;  %2446 = vrot.lane.b32.xlu1 %v5003_v40, %s4537_s10 }
 0xc1d   :  { %4198 = vmatprep.subr.mxu1 %v4539_v61 }
 0xc1e   :  { %4196 = vmatmul.mubr.msk.f32.vlgmr.msra.gmra.mrb[24].mxu1 %vm262_vm9, %v4970_v33 }
 0xc1f   :  { %v5012_v4 = vpop.permute.xlu1 %2064  ;;  %4200 = vmatprep.mubr.msk.f32.mxu1 %vm4541_vm8, %v4539_v61 }
 0xc20   :  { %2598 = vrot.lane.b32.xlu1 %v5012_v4, %s4537_s10 }
 0xc23   :  { %v2143_v5 = vpop.permute.xlu1 %2142 }
 0xc24   :  { %4199 = vmatpush3.xpose.msk.msra.mxu1 %vm262_vm9, %v2143_v5 }
 0xc25   :  { %4208 = vmatprep.subr.mxu1 %v4539_v61 }
 0xc27   :  { %4201 = vmatmul.mubr.msk.f32.vlgmr.msra.gmra.mrb[26].mxu1 %vm262_vm9, %v4968_v31 }
 0xc28   :  { %4210 = vmatprep.mubr.msk.f32.mxu1 %vm4541_vm8, %v4539_v61 }
 0xc85   :  { %v2295_v42 = vpop.permute.xlu1 %2294 }
 0xc86   :  { %v2219_v43 = vpop.permute.xlu0 %2218  ;;  %4209 = vmatpush3.xpose.msk.msra.mxu1 %vm262_vm9, %v2295_v42 }
 0xc87   :  { %4204 = vmatpush3.xpose.msk.msra.mxu0 %vm262_vm9, %v2219_v43  ;;  %4218 = vmatprep.subr.mxu1 %v4539_v61 }
 0xc88   :  { %4213 = vmatprep.subr.mxu0 %v4539_v61 }
 0xc89   :  { %4211 = vmatmul.mubr.msk.f32.vlgmr.msra.gmra.mrb[28].mxu1 %vm262_vm9, %v4988_v2 }
 0xc8a   :  { %4206 = vmatmul.mubr.msk.f32.vlgmr.msra.gmra.mrb[18].mxu0 %vm262_vm9, %v4992_v35  ;;  %v2371_v44 = vpop.permute.xlu0 %2370  ;;  %4220 = vmatprep.mubr.msk.f32.mxu1 %vm4541_vm8, %v4539_v61 }
 0xc8b   :  { %4214 = vmatpush3.xpose.msk.msra.mxu0 %vm262_vm9, %v2371_v44  ;;  %4215 = vmatprep.mubr.msk.f32.mxu0 %vm4541_vm8, %v4539_v61 }
 0xc8c   :  { %4223 = vmatprep.subr.mxu0 %v4539_v61 }
 0xc8e   :  { %4216 = vmatmul.mubr.msk.f32.vlgmr.msra.gmra.mrb[20].mxu0 %vm262_vm9, %v4998_v37  ;;  %v2523_v45 = vpop.permute.xlu0 %2522  ;;  %v2447_v46 = vpop.permute.xlu1 %2446 }
 0xc8f   :  { %4219 = vmatpush3.xpose.msk.msra.mxu1 %vm262_vm9, %v2447_v46  ;;  %4224 = vmatpush3.xpose.msk.msra.mxu0 %vm262_vm9, %v2523_v45 }
 0xc90   :  { %4225 = vmatprep.mubr.msk.f32.mxu0 %vm4541_vm8, %v4539_v61  ;;  %4228 = vmatprep.subr.mxu1 %v4539_v61 }
 0xc91   :  { %4233 = vmatprep.subr.mxu0 %v4539_v61 }
 0xc92   :  { %4221 = vmatmul.mubr.msk.f32.vlgmr.msra.gmra.mrb[30].mxu1 %vm262_vm9, %v5003_v40  ;;  %4226 = vmatmul.mubr.msk.f32.vlgmr.msra.gmra.mrb[22].mxu0 %vm262_vm9, %v4996_v36  ;;  %v2599_v47 = vpop.permute.xlu1 %2598 }
 0xc93   :  { %4229 = vmatpush3.xpose.msk.msra.mxu1 %vm262_vm9, %v2599_v47  ;;  %4230 = vmatprep.mubr.msk.f32.mxu1 %vm4541_vm8, %v4539_v61 }
 0xc94   :  { %4238 = vmatprep.subr.mxu1 %v4539_v61  ;;  %4235 = vmatprep.mubr.msk.f32.mxu0 %vm4541_vm8, %v4539_v61 }
 0xc96   :  { %4231 = vmatmul.mubr.msk.f32.vlgmr.msra.gmra.mrb[32].mxu1 %vm262_vm9, %v5012_v4 }
 0xc97   :  { %4240 = vmatprep.mubr.msk.f32.mxu1 %vm4541_vm8, %v4539_v61 }
 0xcf1   :  { %v2138_v49 = vpop.f32.mrb[24].mxu1 }
 0xcf2   :  { %v2674_v50 = vmul.f32 0.35355338, %v2138_v49  ;;  %v4197_v51 = vpop.f32.mrb[25].mxu1 }
 0xcf4   :  { %v2682_v52 = vsel %vm262_vm9, %v2674_v50, -inf }
 0xcf5   :  { %2683 = vmax.xlane.f32.xlu0 %v2682_v52 }
 0xcfa   :  { %v2214_v53 = vpop.f32.mrb[26].mxu1 }
 0xcfb   :  { %v2675_v56 = vmul.f32 0.35355338, %v2214_v53  ;;  %v4202_v57 = vpop.f32.mrb[27].mxu1 }
 0xcfd   :  { %v2685_v54 = vsel %vm262_vm9, %v2675_v56, -inf }
 0xcfe   :  { %2686 = vmax.xlane.f32.xlu1 %v2685_v54 }
 0xd5c   :  { %v2366_v48 = vpop.f32.mrb[28].mxu1 }
 0xd5d   :  { %v2290_v58 = vpop.f32.mrb[18].mxu0  ;;  %v4212_v59 = vpop.f32.mrb[29].mxu1  ;;  %v2677_v63 = vmul.f32 0.35355338, %v2366_v48 }
 0xd5e   :  { %v2676_v60 = vmul.f32 0.35355338, %v2290_v58  ;;  %v4207_v62 = vpop.f32.mrb[19].mxu0 }
 0xd5f   :  { %v2691_v9 = vsel %vm262_vm9, %v2677_v63, -inf }
 0xd60   :  { %v2688_v0 = vsel %vm262_vm9, %v2676_v60, -inf }
 0xd61   :  { %2689 = vmax.xlane.f32.xlu0 %v2688_v0  ;;  %v2442_v3 = vpop.f32.mrb[20].mxu0 }
 0xd62   :  { %v2678_v6 = vmul.f32 0.35355338, %v2442_v3  ;;  %v4217_v7 = vpop.f32.mrb[21].mxu0 }
 0xd64   :  { %v2694_v8 = vsel %vm262_vm9, %v2678_v6, -inf }
 0xd65   :  { %v2594_v10 = vpop.f32.mrb[22].mxu0  ;;  %2695 = vmax.xlane.f32.xlu1 %v2694_v8  ;;  %2692 = vmax.xlane.f32.xlu0 %v2691_v9  ;;  %v2518_v11 = vpop.f32.mrb[30].mxu1 }
 0xd66   :  { %v2680_v12 = vmul.f32 0.35355338, %v2594_v10  ;;  %v2679_v13 = vmul.f32 0.35355338, %v2518_v11  ;;  %v4222_v14 = vpop.f32.mrb[31].mxu1  ;;  %v4227_v17 = vpop.f32.mrb[23].mxu0 }
 0xd68   :  { %v2700_v18 = vsel %vm262_vm9, %v2680_v12, -inf  ;;  %v2697_v21 = vsel %vm262_vm9, %v2679_v13, -inf }
 0xd69   :  { %2701 = vmax.xlane.f32.xlu1 %v2700_v18  ;;  %2698 = vmax.xlane.f32.xlu0 %v2697_v21  ;;  %v2670_v22 = vpop.f32.mrb[32].mxu1 }
 0xd6a   :  { %v2681_v23 = vmul.f32 0.35355338, %v2670_v22  ;;  %v4232_v24 = vpop.f32.mrb[33].mxu1 }
 0xd6c   :  { %v2703_v25 = vsel %vm262_vm9, %v2681_v23, -inf }
 0xd6d   :  { %2704 = vmax.xlane.f32.xlu0 %v2703_v25 }
 0xd7a   :  { %2770 = vrot.lane.b32.xlu1 %v4970_v33, %s4536_s9 }
 0xd7e   :  { %2922 = vrot.lane.b32.xlu1 %v4992_v35, %s4536_s9 }
 0xd82   :  { %2998 = vrot.lane.b32.xlu1 %v4988_v2, %s4536_s9  ;;  %v2684_v30 = vpop.xlane.xlu0 %2683 }
 0xd83   :  { %2846 = vrot.lane.b32.xlu0 %v4968_v31, %s4536_s9  ;;  %v2706_v32 = vsub.f32 %v2674_v50, %v2684_v30 }
 0xd85   :  { %v2714_v39 = vmul.f32 1.442695, %v2706_v32 }
 0xd86   :  { %3150 = vrot.lane.b32.xlu1 %v5003_v40, %s4536_s9 }
 0xd87   :  { %3074 = vrot.lane.b32.xlu0 %v4998_v37, %s4536_s9 }
 0xd8b   :  { %v2687_v26 = vpop.xlane.xlu1 %2686 }
 0xd8c   :  { %v2707_v55 = vsub.f32 %v2675_v56, %v2687_v26 }
 0xd8e   :  { %v2716_v33 = vmul.f32 1.442695, %v2707_v55 }
 0xd90   :  { %4447 = vpow2.f32 %v2716_v33 }
 0xd91   :  { %4449 = vpow2.f32 %v2714_v39 }
 0xd9a   :  { %v5080_v35 = vpop.eup %4447 }
 0xd9b   :  { %v2733_v2 = vsel %vm262_vm9, %v5080_v35, 0.0  ;;  %v5084_v31 = vpop.eup %4449 }
 0xd9c   :  { %v2730_v40 = vsel %vm262_vm9, %v5084_v31, 0.0 }
 0xda6   :  { %2734 = vadd.xlane.f32.xlu0 %v2733_v2 }
 0xdaa   :  { %2731 = vadd.xlane.f32.xlu1 %v2730_v40 }
 0xdee   :  { %v2690_v37 = vpop.xlane.xlu0 %2689 }
 0xdef   :  { %v2708_v5 = vsub.f32 %v2676_v60, %v2690_v37 }
 0xdf1   :  { %v2718_v42 = vmul.f32 1.442695, %v2708_v5 }
 0xdf2   :  { %v2693_v43 = vpop.xlane.xlu0 %2692  ;;  %v2696_v44 = vpop.xlane.xlu1 %2695 }
 0xdf3   :  { %4451 = vpow2.f32 %v2718_v42  ;;  %v2709_v45 = vsub.f32 %v2677_v63, %v2693_v43  ;;  %v2710_v46 = vsub.f32 %v2678_v6, %v2696_v44 }
 0xdf5   :  { %v2720_v47 = vmul.f32 1.442695, %v2709_v45  ;;  %v2722_v49 = vmul.f32 1.442695, %v2710_v46 }
 0xdf6   :  { %v2699_v50 = vpop.xlane.xlu0 %2698  ;;  %v2702_v51 = vpop.xlane.xlu1 %2701 }
 0xdf7   :  { %4453 = vpow2.f32 %v2720_v47  ;;  %v2711_v52 = vsub.f32 %v2679_v13, %v2699_v50  ;;  %v2712_v53 = vsub.f32 %v2680_v12, %v2702_v51 }
 0xdf8   :  { %4455 = vpow2.f32 %v2722_v49 }
 0xdf9   :  { %v2724_v56 = vmul.f32 1.442695, %v2711_v52  ;;  %v2726_v57 = vmul.f32 1.442695, %v2712_v53 }
 0xdfa   :  { %v2705_v54 = vpop.xlane.xlu0 %2704  ;;  %v2771_v48 = vpop.permute.xlu1 %2770 }
 0xdfb   :  { %4457 = vpow2.f32 %v2724_v56  ;;  %v2713_v58 = vsub.f32 %v2681_v23, %v2705_v54  ;;  %4234 = vmatpush3.msra.mxu0 %v2771_v48  ;;  %v3908_v54 = vld [vmem:[%s5259_s2 + $0x28] sm:$0xff] }
 0xdfc   :  { %4459 = vpow2.f32 %v2726_v57  ;;  %4243 = vmatprep.subr.mxu0 %v4539_v61  ;;  %v3907_v57 = vld [vmem:[%s5259_s2 + $0x20] sm:$0xff] }
 0xdfd   :  { %v4452_v59 = vpop.eup %4451  ;;  %v2728_v60 = vmul.f32 1.442695, %v2713_v58  ;;  %v4362_v48 = vpack.c.bf16 %v3908_v54, %v3907_v57  ;;  %v3910_v58 = vld [vmem:[%s5259_s2 + $0x38] sm:$0xff]  ;;  %v3920_v57 = vld [vmem:[%s5261_s4 + $0x48] sm:$0xff]  ;;  %v3921_v54 = vld [vmem:[%s5261_s4 + $0x50] sm:$0xff] }
 0xdfe   :  { %v2847_v62 = vpop.permute.xlu0 %2846  ;;  %v2736_v63 = vsel %vm262_vm9, %v4452_v59, 0.0  ;;  %v2923_v14 = vpop.permute.xlu1 %2922 }
 0xdff   :  { %4461 = vpow2.f32 %v2728_v60  ;;  %2737 = vadd.xlane.f32.xlu1 %v2736_v63  ;;  %4239 = vmatpush3.msra.mxu1 %v2847_v62 }
 0xe00   :  { %4248 = vmatprep.subr.mxu1 %v4539_v61 }
 0xe01   :  { %v4454_v0 = vpop.eup %4453 }
 0xe02   :  { %v4456_v3 = vpop.eup %4455  ;;  %v2739_v6 = vsel %vm262_vm9, %v4454_v0, 0.0  ;;  %v2999_v17 = vpop.permute.xlu1 %2998 }
 0xe03   :  { %2740 = vadd.xlane.f32.xlu0 %v2739_v6  ;;  %v2742_v7 = vsel %vm262_vm9, %v4456_v3, 0.0  ;;  %v3075_v18 = vpop.permute.xlu0 %3074 }
 0xe04   :  { %2743 = vadd.xlane.f32.xlu1 %v2742_v7 }
 0xe05   :  { %v4458_v8 = vpop.eup %4457 }
 0xe06   :  { %v4460_v9 = vpop.eup %4459  ;;  %v2745_v10 = vsel %vm262_vm9, %v4458_v8, 0.0  ;;  %v3151_v21 = vpop.permute.xlu1 %3150 }
 0xe07   :  { %2746 = vadd.xlane.f32.xlu0 %v2745_v10  ;;  %v2748_v11 = vsel %vm262_vm9, %v4460_v9, 0.0 }
 0xe08   :  { %2749 = vadd.xlane.f32.xlu1 %v2748_v11 }
 0xe09   :  { %v5095_v12 = vpop.eup %4461 }
 0xe0a   :  { %v2751_v13 = vsel %vm262_vm9, %v5095_v12, 0.0 }
 0xe0b   :  { %2752 = vadd.xlane.f32.xlu0 %v2751_v13 }
 0xe19   :  { %3302 = vrot.lane.b32.xlu1 %v5012_v4, %s4536_s9 }
 0xe21   :  { %3226 = vrot.lane.b32.xlu0 %v4996_v36, %s4536_s9 }
 0xe33   :  { %v2735_v22 = vpop.xlane.xlu0 %2734 }
 0xe34   :  { %4463 = vrcp.f32 %v2735_v22 }
 0xe37   :  { %v2732_v23 = vpop.xlane.xlu1 %2731 }
 0xe38   :  { %4465 = vrcp.f32 %v2732_v23 }
 0xe3e   :  { %v4464_v24 = vpop.eup %4463 }
 0xe3f   :  { %v2763_v25 = vmul.f32 %v4464_v24, %v5080_v35 }
 0xe41   :  { %4241 = vmatmul.mubr.msk.f32.vlgmr.msra.gmra.mrb[34].mxu1 %vm262_vm9, %v2763_v25 }
 0xe42   :  { %v4466_v26 = vpop.eup %4465  ;;  %4249 = vmatpush3.msra.mxu1 %v2999_v17  ;;  %4250 = vmatprep.mubr.msk.f32.mxu1 %vm4541_vm8, %v4539_v61 }
 0xe43   :  { %v2762_v36 = vmul.f32 %v4466_v26, %v5084_v31  ;;  %4258 = vmatprep.subr.mxu1 %v4539_v61 }
 0xe45   :  { %4236 = vmatmul.mubr.msk.f32.vlgmr.msra.gmra.mrb[24].mxu0 %vm262_vm9, %v2762_v36 }
 0xe46   :  { %4244 = vmatpush3.msra.mxu0 %v2923_v14  ;;  %4245 = vmatprep.mubr.msk.f32.mxu0 %vm4541_vm8, %v4539_v61 }
 0xe47   :  { %4253 = vmatprep.subr.mxu0 %v4539_v61 }
 0xe8c   :  { %v2738_v4 = vpop.xlane.xlu1 %2737 }
 0xe8d   :  { %4467 = vrcp.f32 %v2738_v4 }
 0xe90   :  { %v2741_v55 = vpop.xlane.xlu0 %2740 }
 0xe91   :  { %4469 = vrcp.f32 %v2741_v55  ;;  %v2744_v30 = vpop.xlane.xlu1 %2743  ;;  %v3416_v55 = vrot.slane %v4964_v29, %v1611_v38 }
 0xe92   :  { %4471 = vrcp.f32 %v2744_v30 }
 0xe94   :  { %v2747_v32 = vpop.xlane.xlu0 %2746 }
 0xe95   :  { %4473 = vrcp.f32 %v2747_v32  ;;  %v2750_v33 = vpop.xlane.xlu1 %2749 }
 0xe96   :  { %4475 = vrcp.f32 %v2750_v33 }
 0xe97   :  { %v4468_v39 = vpop.eup %4467 }
 0xe98   :  { %v2764_v35 = vmul.f32 %v4468_v39, %v4452_v59  ;;  %v2753_v2 = vpop.xlane.xlu0 %2752 }
 0xe99   :  { %4477 = vrcp.f32 %v2753_v2  ;;  %v3303_v47 = vpop.permute.xlu1 %3302 }
 0xe9a   :  { %4246 = vmatmul.mubr.msk.f32.vlgmr.msra.gmra.mrb[26].mxu0 %vm262_vm9, %v2764_v35 }
 0xe9b   :  { %v4470_v31 = vpop.eup %4469  ;;  %4254 = vmatpush3.msra.mxu0 %v3075_v18  ;;  %4255 = vmatprep.mubr.msk.f32.mxu0 %vm4541_vm8, %v4539_v61 }
 0xe9c   :  { %v4472_v40 = vpop.eup %4471  ;;  %v2765_v37 = vmul.f32 %v4470_v31, %v4454_v0  ;;  %4263 = vmatprep.subr.mxu0 %v4539_v61  ;;  %v3227_v42 = vpop.permute.xlu0 %3226 }
 0xe9d   :  { %v2766_v5 = vmul.f32 %v4472_v40, %v4456_v3 }
 0xe9e   :  { %4251 = vmatmul.mubr.msk.f32.vlgmr.msra.gmra.mrb[36].mxu1 %vm262_vm9, %v2765_v37 }
 0xe9f   :  { %v4474_v43 = vpop.eup %4473  ;;  %4256 = vmatmul.mubr.msk.f32.vlgmr.msra.gmra.mrb[28].mxu0 %vm262_vm9, %v2766_v5  ;;  %4259 = vmatpush3.msra.mxu1 %v3151_v21 }
 0xea0   :  { %v4476_v44 = vpop.eup %4475  ;;  %v2767_v45 = vmul.f32 %v4474_v43, %v4458_v8  ;;  %4264 = vmatpush3.msra.mxu0 %v3227_v42  ;;  %4260 = vmatprep.mubr.msk.f32.mxu1 %vm4541_vm8, %v4539_v61 }
 0xea1   :  { %v2768_v46 = vmul.f32 %v4476_v44, %v4460_v9  ;;  %4265 = vmatprep.mubr.msk.f32.mxu0 %vm4541_vm8, %v4539_v61  ;;  %4268 = vmatprep.subr.mxu1 %v4539_v61 }
 0xea2   :  { %4261 = vmatmul.mubr.msk.f32.vlgmr.msra.gmra.mrb[38].mxu1 %vm262_vm9, %v2767_v45  ;;  %4363 = vmatprep.subr.bf16.mxu0 %v4362_v48 }
 0xea3   :  { %v4478_v49 = vpop.eup %4477  ;;  %4266 = vmatmul.mubr.msk.f32.vlgmr.msra.gmra.mrb[30].mxu0 %vm262_vm9, %v2768_v46  ;;  %4269 = vmatpush3.msra.mxu1 %v3303_v47 }
 0xea4   :  { %v2769_v50 = vmul.f32 %v4478_v49, %v5095_v12  ;;  %4270 = vmatprep.mubr.msk.f32.mxu1 %vm4541_vm8, %v4539_v61  ;;  %4365 = vmatpush3.bf16.msra.mxu0 %v4362_v48  ;;  %v3909_v61 = vld [vmem:[%s5259_s2 + $0x30] sm:$0xff]  ;;  %v3914_v49 = vld [vmem:[%s5260_s3 + $0x28] sm:$0xff] }
 0xea5   :  { %v4366_v59 = vpack.c.bf16 %v3910_v58, %v3909_v61  ;;  %v3922_v61 = vld [vmem:[%s5261_s4 + $0x58] sm:$0xff] }
 0xea6   :  { %4271 = vmatmul.mubr.msk.f32.vlgmr.msra.gmra.mrb[40].mxu1 %vm262_vm9, %v2769_v50  ;;  %v4382_v58 = vpack.c.bf16 %v3922_v61, %v3921_v54 }
 0xea7   :  { %4367 = vmatprep.subr.bf16.mxu0 %v4366_v59 }
 0xea8   :  { %4369 = vmatpush3.bf16.msra.mxu0 %v4366_v59  ;;  %v3923_v59 = vld [vmem:[%s5261_s4 + $0x60] sm:$0xff] }
 0xf14   :  { %v2918_v51 = vpop.f32.mrb[34].mxu1 }
 0xf15   :  { %v4242_v52 = vpop.f32.mrb[35].mxu1 }
 0xf16   :  { %v3916_v52 = vld [vmem:[%s5260_s3 + $0x38] sm:$0xff] }
 0xf18   :  { %v2842_v53 = vpop.f32.mrb[24].mxu0 }
 0xf19   :  { %v4237_v56 = vpop.f32.mrb[25].mxu0 }
 0xf1a   :  { %v3919_v56 = vld [vmem:[%s5261_s4 + $0x40] sm:$0xff] }
 0xf1b   :  { %v4378_v48 = vpack.c.bf16 %v3920_v57, %v3919_v56  ;;  %v3755_v56 = vrot.slane %v4964_v29, %v1950_v15 }
 0xf1d   :  { %4379 = vmatprep.subr.bf16.mxu0 %v4378_v48 }
 0xf6d   :  { %v2994_v60 = vpop.f32.mrb[26].mxu0 }
 0xf6e   :  { %3380 = vrot.lane.b32.xlu0 %v2994_v60, %s4544_s8  ;;  %v4247_v62 = vpop.f32.mrb[27].mxu0  ;;  %v3924_v60 = vld [vmem:[%s5261_s4 + $0x68] sm:$0xff] }
 0xf6f   :  { %v4386_v62 = vpack.c.bf16 %v3924_v60, %v3923_v59 }
 0xf71   :  { %v3070_v63 = vpop.f32.mrb[36].mxu1 }
 0xf72   :  { %v3146_v0 = vpop.f32.mrb[28].mxu0  ;;  %3382 = vrot.lane.b32.xlu1 %v3070_v63, %s4544_s8  ;;  %v4252_v3 = vpop.f32.mrb[37].mxu1 }
 0xf73   :  { %3388 = vrot.lane.b32.xlu0 %v3146_v0, %s4545_s11  ;;  %v4257_v6 = vpop.f32.mrb[29].mxu0 }
 0xf75   :  { %v3222_v7 = vpop.f32.mrb[38].mxu1 }
 0xf76   :  { %v3298_v8 = vpop.f32.mrb[30].mxu0  ;;  %3390 = vrot.lane.b32.xlu1 %v3222_v7, %s4545_s11  ;;  %v4262_v9 = vpop.f32.mrb[39].mxu1 }
 0xf77   :  { %3396 = vrot.lane.b32.xlu0 %v3298_v8, %s4546_s0  ;;  %v4267_v10 = vpop.f32.mrb[31].mxu0  ;;  %v3529_v9 = vrot.slane %v4964_v29, %v1725_v19  ;;  %v3925_v19 = vld [vmem:[%s5261_s4 + $0x70] sm:$0xff] }
 0xf79   :  { %v3374_v11 = vpop.f32.mrb[40].mxu1 }
 0xf7a   :  { %3398 = vrot.lane.b32.xlu1 %v3374_v11, %s4546_s0  ;;  %v4272_v12 = vpop.f32.mrb[41].mxu1 }
 0xf7b   :  { %v3535_v12 = vrot.slane %v4964_v29, %v1731_v20  ;;  %v3546_v20 = vrot.slane %v4964_v29, %v1741_v34 }
 0xfe0   :  { %v3381_v13 = vpop.permute.xlu0 %3380 }
 0xfe1   :  { %v3402_v18 = vsel %vm262_vm9, %v2842_v53, %v3381_v13 }
 0xfe4   :  { %v3383_v14 = vpop.permute.xlu1 %3382 }
 0xfe5   :  { %v3389_v17 = vpop.permute.xlu0 %3388  ;;  %v3403_v25 = vsel %vm262_vm9, %v2918_v51, %v3383_v14  ;;  %v3915_v51 = vld [vmem:[%s5260_s3 + $0x30] sm:$0xff] }
 0xfe6   :  { %v3404_v22 = vsel %vm1599_vm10, %v3402_v18, %v3389_v17  ;;  %v4374_v53 = vpack.c.bf16 %v3916_v52, %v3915_v51 }
 0xfe8   :  { %v3391_v21 = vpop.permute.xlu1 %3390 }
 0xfe9   :  { %v3397_v23 = vpop.permute.xlu0 %3396  ;;  %v3405_v26 = vsel %vm1599_vm10, %v3403_v25, %v3391_v21 }
 0xfea   :  { %v3406_v24 = vsel %vm1602_vm11, %v3404_v22, %v3397_v23  ;;  %v3926_v23 = vld [vmem:[%s5261_s4 + $0x78] sm:$0xff]  ;;  %s4547_s4 = smov [#allocation5]  }
 0xfeb   :  { %4281 = vmatprep.mubr.msk.f32.mxu0 %vm164_vm7, %v3406_v24  ;;  %v4390_v24 = vpack.c.bf16 %v3926_v23, %v3925_v19 }
 0xfec   :  { %v3399_v36 = vpop.permute.xlu1 %3398 }
 0xfed   :  { %v3407_v4 = vsel %vm1602_vm11, %v3405_v26, %v3399_v36 }
 0xfee   :  { %4282 = vmatmul.mubr.msk.f32.vlgmr.msra.gmra.mrb[32].mxu0 %vm164_vm7, %v3407_v4 }
 0xfef   :  { %4381 = vmatpush3.bf16.msra.mxu0 %v4378_v48  ;;  %v3761_v48 = vrot.slane %v4964_v29, %v1956_v16 }
 0xff0   :  { %4383 = vmatprep.subr.bf16.mxu0 %v4382_v58 }
 0xff3   :  { %4385 = vmatpush3.bf16.msra.mxu0 %v4382_v58 }
 0xff4   :  { %4387 = vmatprep.subr.bf16.mxu0 %v4386_v62 }
 0xff7   :  { %4389 = vmatpush3.bf16.msra.mxu0 %v4386_v62 }
 0xff8   :  { %4391 = vmatprep.subr.bf16.mxu0 %v4390_v24 }
 0xffb   :  { %4393 = vmatpush3.bf16.msra.mxu0 %v4390_v24 }
0x10c1   :  { %v4283_v30 = vpop.f32.mrb[32].mxu0 }
0x10c2   :  { %v3495_v32 = vadd.f32 %v4283_v30, %v3416_v55  ;;  %v3489_v33 = vpop.f32.mrb[33].mxu0 }
0x10c3   :  { %v3490_v39 = vadd.f32 %v3489_v33, %v3416_v55 }
0x10c4   :  { %v3499_v35 = vadd.f32 %v3495_v32, %v4953_v28  ;;  %v3642_v32 = vrot.slane %v4964_v29, %v1836_v41 }
0x10c5   :  { %v3498_v2 = vadd.f32 %v3490_v39, %v4951_v27  ;;  %v3913_v27 = vld [vmem:[%s5260_s3 + $0x20] sm:$0xff] }
0x10c6   :  { %v3503_v31 = vsel %vm164_vm7, %v3499_v35, 0.0  ;;  %v4370_v50 = vpack.c.bf16 %v3914_v49, %v3913_v27 }
0x10c7   :  { %3504 = vadd.xlane.f32.xlu1 %v3503_v31  ;;  %v3500_v40 = vsel %vm164_vm7, %v3498_v2, 0.0 }
0x10c8   :  { %3501 = vadd.xlane.f32.xlu0 %v3500_v40  ;;  %4371 = vmatprep.subr.bf16.mxu1 %v4370_v50 }
0x10c9   :  { %4373 = vmatpush3.bf16.msra.mxu1 %v4370_v50 }
0x10ca   :  { %4375 = vmatprep.subr.bf16.mxu1 %v4374_v53 }
0x10cd   :  { %4377 = vmatpush3.bf16.msra.mxu1 %v4374_v53 }
0x1154   :  { %v3505_v37 = vpop.xlane.xlu1 %3504 }
0x1155   :  { %v3507_v5 = vmul.f32 0.03125, %v3505_v37  ;;  %v3502_v42 = vpop.xlane.xlu0 %3501 }
0x1156   :  { %v3506_v43 = vmul.f32 0.03125, %v3502_v42 }
0x1157   :  { %v3509_v44 = vsub.f32 %v3499_v35, %v3507_v5 }
0x1158   :  { %v3508_v38 = vsub.f32 %v3498_v2, %v3506_v43 }
0x1159   :  { %v3511_v47 = vmul.f32 %v3509_v44, %v3509_v44 }
0x115a   :  { %v3510_v45 = vmul.f32 %v3508_v38, %v3508_v38 }
0x115b   :  { %v3515_v28 = vsel %vm164_vm7, %v3511_v47, 0.0 }
0x115c   :  { %v3512_v46 = vsel %vm164_vm7, %v3510_v45, 0.0 }
0x115d   :  { %3513 = vadd.xlane.f32.xlu0 %v3512_v46 }
0x1161   :  { %3516 = vadd.xlane.f32.xlu0 %v3515_v28 }
0x11ea   :  { %v3514_v63 = vpop.xlane.xlu0 %3513 }
0x11eb   :  { %v3518_v0 = vmul.f32 0.03125, %v3514_v63 }
0x11ed   :  { %v3520_v3 = vadd.f32 1e-05, %v3518_v0 }
0x11ee   :  { %v3517_v6 = vpop.xlane.xlu0 %3516 }
0x11ef   :  { %4479 = vrsqrt.f32 %v3520_v3  ;;  %v3519_v7 = vmul.f32 0.03125, %v3517_v6 }
0x11f1   :  { %v3521_v8 = vadd.f32 1e-05, %v3519_v7 }
0x11f3   :  { %4481 = vrsqrt.f32 %v3521_v8 }
0x11f9   :  { %v4480_v10 = vpop.eup %4479 }
0x11fa   :  { %v3524_v11 = vmul.f32 %v4480_v10, %v3508_v38 }
0x11fc   :  { %v3530_v13 = vmul.f32 %v3529_v9, %v3524_v11 }
0x11fd   :  { %v4482_v14 = vpop.eup %4481 }
0x11fe   :  { %v3525_v17 = vmul.f32 %v4482_v14, %v3509_v44  ;;  %v3536_v18 = vadd.f32 %v3535_v12, %v3530_v13 }
0x1200   :  { %v3531_v21 = vmul.f32 %v3529_v9, %v3525_v17  ;;  %4292 = vmatprep.mubr.msk.f32.mxu1 %vm164_vm7, %v3536_v18 }
0x1202   :  { %v3537_v22 = vadd.f32 %v3535_v12, %v3531_v21 }
0x1204   :  { %4293 = vmatmul.mubr.msk.f32.vlgmr.msra.gmra.mrb[42].mxu1 %vm164_vm7, %v3537_v22 }
0x12d7   :  { %v4294_v25 = vpop.f32.mrb[42].mxu1 }
0x12d8   :  { %v3625_v26 = vadd.f32 %v4294_v25, %v3546_v20  ;;  %v3619_v36 = vpop.f32.mrb[43].mxu1 }
0x12d9   :  { %v3620_v4 = vadd.f32 %v3619_v36, %v3546_v20 }
0x12da   :  { %v3629_v30 = vmax.f32 %v3625_v26, 0.0 }
0x12db   :  { %v3628_v55 = vmax.f32 %v3620_v4, 0.0 }
0x12dd   :  { %4311 = vmatprep.mubr.msk.f32.mxu0 %vm1838_vm12, %v3628_v55 }
0x12de   :  { %4312 = vmatmul.mubr.msk.f32.vlgmr.msra.gmra.mrb[34].mxu0 %vm1838_vm12, %v3629_v30 }
0x13b1   :  { %v4313_v33 = vpop.f32.mrb[34].mxu0 }
0x13b2   :  { %v3721_v39 = vadd.f32 %v4313_v33, %v3642_v32  ;;  %v3715_v35 = vpop.f32.mrb[35].mxu0 }
0x13b3   :  { %v3716_v2 = vadd.f32 %v3715_v35, %v3642_v32 }
0x13b4   :  { %v3725_v31 = vadd.f32 %v3721_v39, %v3537_v22 }
0x13b5   :  { %v3724_v34 = vadd.f32 %v3716_v2, %v3536_v18 }
0x13b6   :  { %v3729_v40 = vsel %vm164_vm7, %v3725_v31, 0.0 }
0x13b7   :  { %3730 = vadd.xlane.f32.xlu0 %v3729_v40  ;;  %v3726_v37 = vsel %vm164_vm7, %v3724_v34, 0.0 }
0x13b8   :  { %3727 = vadd.xlane.f32.xlu1 %v3726_v37 }
0x1444   :  { %v3731_v5 = vpop.xlane.xlu0 %3730 }
0x1445   :  { %v3733_v42 = vmul.f32 0.03125, %v3731_v5  ;;  %v3728_v43 = vpop.xlane.xlu1 %3727 }
0x1446   :  { %v3732_v44 = vmul.f32 0.03125, %v3728_v43 }
0x1447   :  { %v3735_v38 = vsub.f32 %v3725_v31, %v3733_v42 }
0x1448   :  { %v3734_v45 = vsub.f32 %v3724_v34, %v3732_v44 }
0x1449   :  { %v3737_v46 = vmul.f32 %v3735_v38, %v3735_v38 }
0x144a   :  { %v3736_v41 = vmul.f32 %v3734_v45, %v3734_v45 }
0x144b   :  { %v3741_v47 = vsel %vm164_vm7, %v3737_v46, 0.0 }
0x144c   :  { %3742 = vadd.xlane.f32.xlu0 %v3741_v47  ;;  %v3738_v28 = vsel %vm164_vm7, %v3736_v41, 0.0 }
0x144d   :  { %3739 = vadd.xlane.f32.xlu1 %v3738_v28 }
0x14d9   :  { %v3743_v27 = vpop.xlane.xlu0 %3742 }
0x14da   :  { %v3745_v49 = vmul.f32 0.03125, %v3743_v27  ;;  %v3740_v50 = vpop.xlane.xlu1 %3739 }
0x14db   :  { %v3744_v51 = vmul.f32 0.03125, %v3740_v50 }
0x14dc   :  { %v3747_v52 = vadd.f32 1e-05, %v3745_v49 }
0x14dd   :  { %v3746_v53 = vadd.f32 1e-05, %v3744_v51 }
0x14de   :  { %4483 = vrsqrt.f32 %v3747_v52 }
0x14df   :  { %4485 = vrsqrt.f32 %v3746_v53 }
0x14e8   :  { %v4484_v57 = vpop.eup %4483 }
0x14e9   :  { %v4486_v54 = vpop.eup %4485  ;;  %v3751_v61 = vmul.f32 %v4484_v57, %v3735_v38 }
0x14ea   :  { %v3750_v58 = vmul.f32 %v4486_v54, %v3734_v45 }
0x14eb   :  { %v3757_v59 = vmul.f32 %v3755_v56, %v3751_v61 }
0x14ec   :  { %v3756_v60 = vmul.f32 %v3755_v56, %v3750_v58 }
0x14ed   :  { %v3763_v62 = vadd.f32 %v3761_v48, %v3757_v59 }
0x14ee   :  { %v3762_v63 = vadd.f32 %v3761_v48, %v3756_v60 }
0x14ef   :  { %v3792_v0 = vrot.slane %v3763_v62, 4  ;;  %v3782_v3 = vrot.slane %v3763_v62, 2  ;;  %v3776_v6 = vrot.slane %v3763_v62, 1  ;;  %v3798_v7 = vrot.slane %v3763_v62, 5 }
0x14f0   :  { %v3791_v8 = vrot.slane %v3762_v63, 5  ;;  %v3770_v9 = vrot.slane %v3762_v63, 1  ;;  %v3781_v15 = vrot.slane %v3762_v63, 3  ;;  %v3775_v10 = vrot.slane %v3762_v63, 2 }
0x14f1   :  { %v3797_v11 = vrot.slane %v3762_v63, 6  ;;  %v3803_v12 = vrot.slane %v3762_v63, 7  ;;  %v3804_v1 = vrot.slane %v3763_v62, 6  ;;  %v3788_v13 = vrot.slane %v3763_v62, 3 }
0x14f2   :  { %v3793_v16 = vsel %vm3767_vm13, %v3792_v0, %v3791_v8  ;;  %v3771_v29 = vsel %vm3767_vm13, %v3763_v62, %v3770_v9  ;;  %v3783_v14 = vsel %vm3767_vm13, %v3782_v3, %v3781_v15  ;;  %v3777_v17 = vsel %vm3767_vm13, %v3776_v6, %v3775_v10 }
0x14f3   :  { %3794 = vrot.lane.b32.xlu0 %v3793_v16, %s4538_s18  ;;  %3772 = vrot.lane.b32.xlu1 %v3771_v29, %s4538_s18  ;;  %v3799_v18 = vsel %vm3767_vm13, %v3798_v7, %v3797_v11  ;;  %v3805_v21 = vsel %vm3767_vm13, %v3804_v1, %v3803_v12  ;;  %v3787_v22 = vrot.slane %v3762_v63, 4  ;;  %v3766_v19 = vrot.slane %v3763_v62, 7  ;;  %s3834_s18 = sshll.u32 %s4547_s4, 4  ;;  %s3835_s18 = int_to_ptr.vmem [resolvable:$true] %s3834_s18 }
0x14f4   :  { %p4514_p9 = scmp.lt.s32.totalorder %s3835_s18, %s3835_s18 }
0x14f5   :  { %v3789_v23 = vsel %vm3767_vm13, %v3788_v13, %v3787_v22  ;;  %v3768_v24 = vsel %vm3767_vm13, %v3766_v19, %v3762_v63 }
0x14f7   :  { %3784 = vrot.lane.b32.xlu0 %v3783_v14, %s4537_s10  ;;  %3778 = vrot.lane.b32.xlu1 %v3777_v17, %s4536_s9 }
0x14fb   :  { %3800 = vrot.lane.b32.xlu1 %v3799_v18, %s4536_s9  ;;  %s4509_s9 = scalar_lea.vmem %s3835_s18, 64 }
0x14fc   :  { %p4510_p8 = scmp.ne.s32.totalorder %s3835_s18, %s4509_s9  ;;  %p4515_p10 = scmp.lt.s32.totalorder %s4509_s9, %s4509_s9 }
0x14fe   :  { %p4516_p11 = por %p4515_p10, %p4514_p9 }
0x14ff   :  { %3806 = vrot.lane.b32.xlu1 %v3805_v21, %s4537_s10 }
0x1500   :  { %p4517_p12 = pnand %p4516_p11, %p4510_p8 }
0x1565   :  { %v3773_v20 = vpop.permute.xlu1 %3772  ;;  %v3795_v25 = vpop.permute.xlu0 %3794 }
0x1566   :  { %v3809_v4 = vsel %vm164_vm7, %v3768_v24, %v3773_v20  ;;  %v3813_v32 = vsel %vm164_vm7, %v3789_v23, %v3795_v25 }
0x1569   :  { %v3779_v26 = vpop.permute.xlu1 %3778  ;;  %v3785_v55 = vpop.permute.xlu0 %3784 }
0x156a   :  { %v3810_v30 = vsel %vm1838_vm12, %v3809_v4, %v3779_v26 }
0x156b   :  { %v3812_v35 = vsel %vm3811_vm14, %v3810_v30, %v3785_v55 }
0x156d   :  { %v3801_v36 = vpop.permute.xlu1 %3800 }
0x156e   :  { %v3814_v33 = vsel %vm1838_vm12, %v3813_v32, %v3801_v36 }
0x1571   :  { %v3807_v39 = vpop.permute.xlu1 %3806 }
0x1572   :  { %v3815_v2 = vsel %vm3811_vm14, %v3814_v33, %v3807_v39 }
0x1573   :  { %v3818_v31 = vcombine.low %v3812_v35, %v3815_v2 }
0x1575   :  { %3929 = vst.sshfl [vmem:[#allocation5] sm:$0x33 pattern:$0x76325410] %v3818_v31 }
0x1576   :  { %4520 = shalt.err (!%p4517_p12)
}
0x1577   :  { %s4521_s16 = scalar_lea.hbm %s5263_s6, 64 }
0x1578   :  { %p4522_p13 = scmp.ne.s32.totalorder %s5263_s6, %s4521_s16  ;;  %p4525_p0 = scmp.lt.u32.totalorder %s4521_s16, %s5263_s6 }
0x157a   :  { %p4527_p1 = pnand %p4525_p0, %p4522_p13 }
0x157c   :  { %4530 = shalt.err (!%p4527_p1)
}
0x157d   :  { %3837 = dma.vmem_to_hbm [thread:$0]  %s3835_s18, 64, %s5263_s6, [#allocation4]  }
0x157e   :  { %4533 = dma.done.wait [#allocation4], 64  }
0x157f   :  { %4534 = vsyncadd [#allocation4], 4294967232 }
0x1580   :  { %3841 = vsyncpa [#allocation3], 1 }
0x1581   :  { %3842 = vsyncpa [#allocation4], 1 }

</bundles_post_ra>
